<compile_context>
chip_gen: v6e
topology: v6e:2x2x1
jax: 0.10.0
libtpu: 0.0.40
codegen_flags: <defaults>
</compile_context>

<pallas_src>
import functools

import jax
import jax.numpy as jnp
import numpy as np
from jax.experimental import pallas as pl
from jax.experimental.pallas import tpu as pltpu


def _round_up(x, m):
    return (x + m - 1) // m * m


def _conv_tap_kernel(x_ref, w_ref, b_ref, o_ref, *, kh_sz, kw_sz, h_tile, wout):
    """One (m-tile, cout-tile) output block.

    x_ref: (1, h_tile + KH - 1, Wp, Cin)   halo'd activation slab
    w_ref: (KH, KW, Cin, cout_tile)        resident folded weights
    b_ref: (1, cout_tile)                  resident bias (f32)
    o_ref: (h_tile * Wout, cout_tile)      lane-dense output tile
    """
    x = x_ref[0]                                         # (h_slab, Wp, Cin)
    acc = None
    for kh in range(kh_sz):
        for kw in range(kw_sz):
            # Static shifted window of the slab -> (h_tile*Wout, Cin) LHS.
            lhs = x[kh:kh + h_tile, kw:kw + wout, :]
            lhs = lhs.reshape(h_tile * wout, lhs.shape[-1])
            tap = jnp.dot(lhs, w_ref[kh, kw],
                          preferred_element_type=jnp.float32)
            acc = tap if acc is None else acc + tap
    o_ref[...] = (acc + b_ref[...]).astype(o_ref.dtype)


def conv2d_reflect(x_nchw, weight_oihw, bias, *, compute_dtype=jnp.bfloat16,
                   m_rows_target=512, vmem_budget_bytes=36 * 1024 * 1024):
    """Forward pass of the PyTorch `Conv2d` module with default settings
    (stride=1, dilation=1, groups=1, bias=True, padding=None,
    padding_type='REFLECTION'):

        ReflectionPad2d((floor((k0-1)/2), ceil((k0-1)/2),
                         floor((k1-1)/2), ceil((k1-1)/2)))  ->  Conv2d(padding=0)

    Note the module's 4-tuple is (left, right, top, bottom): the W axis is
    padded from kernel_size[0] (= KH) and the H axis from kernel_size[1]
    (= KW).  We match the module exactly (identical for square kernels).

    Takes/returns PyTorch layouts (NCHW input, OIHW weight, (Cout,) bias).
    """
    N, Cin, H, W = x_nchw.shape
    Cout, Cin_w, KH, KW = weight_oihw.shape
    assert Cin == Cin_w, (Cin, Cin_w)

    out_dtype = x_nchw.dtype
    if compute_dtype is None:
        compute_dtype = out_dtype
    in_bytes = jnp.dtype(compute_dtype).itemsize
    out_bytes = jnp.dtype(out_dtype).itemsize

    # Padding exactly as the module builds it: (left, right, top, bottom).
    pad_l = (KH - 1) // 2
    pad_r = (KH - 1) - pad_l          # W axis, from kernel_size[0]
    pad_t = (KW - 1) // 2
    pad_b = (KW - 1) - pad_t          # H axis, from kernel_size[1]
    # PyTorch ReflectionPad2d requires pad < spatial extent.
    assert pad_t < H and pad_b < H and pad_l < W and pad_r < W, \
        "reflection padding needs inputs larger than the kernel radius"

    Hp = H + pad_t + pad_b            # = H + KW - 1
    Wp = W + pad_l + pad_r            # = W + KH - 1
    Hout = Hp - KH + 1
    Wout = Wp - KW + 1
    assert Hout > 0 and Wout > 0, (Hout, Wout)

    # ---------------- tile / VMEM budgeting ----------------
    cout_pad = _round_up(Cout, 128)   # lane-dense output (unmasked vst)

    def w_tile_bytes(ct):             # double-buffered weight block
        return 2 * KH * KW * Cin * ct * in_bytes

    # Full-cout residency when it fits; otherwise 256/128-wide weight tiles.
    # The cout grid axis stays innermost so activations are streamed once and
    # only the (small) weight blocks are re-fetched per M tile.
    if w_tile_bytes(cout_pad) <= vmem_budget_bytes // 3:
        cout_tile = cout_pad
    elif cout_pad >= 256 and w_tile_bytes(256) <= vmem_budget_bytes // 3:
        cout_tile = 256
    else:
        cout_tile = 128

    # h_tile: ~m_rows_target output rows per grid step, multiple of 8 (the
    # flat M block h_tile*Wout is then a multiple of 16 for bf16 whenever Wout
    # is even), auto-shrunk to fit the VMEM budget.
    h_tile = _round_up(max(1, pl.cdiv(m_rows_target, Wout)), 8)
    h_tile = min(h_tile, _round_up(Hout, 8))

    def vmem_est(ht):
        h_slab_ = ht + KH - 1
        return (2 * h_slab_ * Wp * Cin * in_bytes          # x slab (dbl-buffered)
                + w_tile_bytes(cout_tile)                  # resident weights
                + 2 * ht * Wout * cout_tile * out_bytes    # output tile
                + ht * Wout * cout_tile * 4                # f32 accumulator
                + 2 * cout_tile * 4)                       # bias

    while h_tile > 8 and vmem_est(h_tile) > vmem_budget_bytes:
        h_tile -= 8

    h_slab = h_tile + KH - 1
    num_ht = pl.cdiv(Hout, h_tile)
    num_j = cout_pad // cout_tile

    # ------------- plain-JAX glue: layout, reflection pad, halo slabs -------
    x = jnp.transpose(x_nchw, (0, 2, 3, 1)).astype(compute_dtype)   # NHWC
    x_pad = jnp.pad(x, ((0, 0), (pad_t, pad_b), (pad_l, pad_r), (0, 0)),
                    mode="reflect")
    # Zero-pad H so the last tile's halo slab is in-bounds (the extra rows only
    # feed output rows >= Hout, which are sliced off below).
    h_rows_needed = num_ht * h_tile + KH - 1
    x_pad = jnp.pad(x_pad, ((0, 0), (0, h_rows_needed - Hp), (0, 0), (0, 0)))

    # Overlapping H slabs (overlap = KH-1 rows; ~3% duplication for 3x3).
    slabs = [x_pad[:, t * h_tile: t * h_tile + h_slab] for t in range(num_ht)]
    x_slab = jnp.stack(slabs, axis=1).reshape(N * num_ht, h_slab, Wp, Cin)

    # Weight OIHW -> (KH, KW, Cin, cout_pad); bias -> (1, cout_pad) f32.
    w = jnp.transpose(weight_oihw, (2, 3, 1, 0)).astype(compute_dtype)
    w = jnp.pad(w, ((0, 0), (0, 0), (0, 0), (0, cout_pad - Cout)))
    b = jnp.pad(bias.astype(jnp.float32).reshape(1, Cout),
                ((0, 0), (0, cout_pad - Cout)))

    # ---------------- pallas call ----------------
    m_tiles = N * num_ht
    m_block = h_tile * Wout
    kernel = functools.partial(_conv_tap_kernel, kh_sz=KH, kw_sz=KW,
                               h_tile=h_tile, wout=Wout)

    flops = 2 * N * Hout * Wout * KH * KW * Cin * Cout
    bytes_accessed = (x_slab.size * in_bytes + w.size * in_bytes + b.size * 4
                      + m_tiles * m_block * cout_pad * out_bytes)

    out_flat = pl.pallas_call(
        kernel,
        out_shape=jax.ShapeDtypeStruct((m_tiles * m_block, cout_pad), out_dtype),
        grid_spec=pltpu.PrefetchScalarGridSpec(
            num_scalar_prefetch=0,
            grid=(m_tiles, num_j),          # cout innermost: x streamed once
            in_specs=[
                pl.BlockSpec((1, h_slab, Wp, Cin), lambda i, j: (i, 0, 0, 0)),
                pl.BlockSpec((KH, KW, Cin, cout_tile), lambda i, j: (0, 0, 0, j)),
                pl.BlockSpec((1, cout_tile), lambda i, j: (0, j)),
            ],
            out_specs=pl.BlockSpec((m_block, cout_tile), lambda i, j: (i, j)),
        ),
        compiler_params=pltpu.CompilerParams(
            dimension_semantics=("parallel", "parallel"),
            vmem_limit_bytes=48 * 1024 * 1024),
        cost_estimate=pl.CostEstimate(flops=int(flops), transcendentals=0,
                                      bytes_accessed=int(bytes_accessed)),
    )(x_slab, w, b)

    out = out_flat.reshape(N, num_ht * h_tile, Wout, cout_pad)
    out = out[:, :Hout, :, :Cout]
    return jnp.transpose(out, (0, 3, 1, 2))      # back to NCHW


if __name__ == "__main__":
    key = jax.random.PRNGKey(0)
    k1, k2, k3 = jax.random.split(key, 3)

    N, Cin, H, W = 2, 4, 16, 16
    Cout, Ksz = 8, 3

    x = jax.random.normal(k1, (N, Cin, H, W), dtype=jnp.float32)
    # deterministic synthetic parameters (shapes from nn.Conv2d(Cin, Cout, K))
    weight = jax.random.normal(k2, (Cout, Cin, Ksz, Ksz), dtype=jnp.float32) * 0.1
    bias = jax.random.normal(k3, (Cout,), dtype=jnp.float32) * 0.1

    # Reference: reflection pad + lax conv (pure JAX).
    x_refpad = jnp.pad(x, ((0, 0), (0, 0), (1, 1), (1, 1)), mode="reflect")
    ref = jax.lax.conv_general_dilated(
        x_refpad, weight, window_strides=(1, 1), padding="VALID",
        dimension_numbers=("NCHW", "OIHW", "NCHW"))
    ref = np.asarray(ref + bias.reshape(1, Cout, 1, 1))

    # f32 operand path: tight correctness check.
    conv_f32 = jax.jit(functools.partial(conv2d_reflect,
                                         compute_dtype=jnp.float32))
    out = jax.block_until_ready(conv_f32(x, weight, bias))
    assert out.shape == (N, Cout, H, W), out.shape
    np.testing.assert_allclose(np.asarray(out), ref, rtol=1e-5, atol=1e-5)

    # Production default (bf16 operands, f32 MXU accumulation): loose check.
    conv_bf16 = jax.jit(conv2d_reflect)
    out_bf16 = jax.block_until_ready(conv_bf16(x, weight, bias))
    assert out_bf16.shape == (N, Cout, H, W), out_bf16.shape
    np.testing.assert_allclose(np.asarray(out_bf16), ref, rtol=3e-2, atol=3e-2)

    print("KERNEL_OK")
</pallas_src>

<mosaic_0001>
module attributes {stable_mosaic.version = 11 : i64} {
  func.func @_conv_tap_kernel(%arg0: i32, %arg1: i32, %arg2: memref<1x18x18x4xf32, #tpu.memory_space<vmem>>, %arg3: memref<3x3x4x128xf32, #tpu.memory_space<vmem>>, %arg4: memref<1x128xf32, #tpu.memory_space<vmem>>, %arg5: memref<256x128xf32, #tpu.memory_space<vmem>>) attributes {dimension_semantics = [#tpu.dimension_semantics<parallel>, #tpu.dimension_semantics<parallel>], iteration_bounds = array<i64: 2, 1>, scalar_prefetch = 0 : i64, scratch_operands = 0 : i64, tpu.core_type = #tpu.core_type<tc>, window_params = [{transform_indices = @transform_0, window_bounds = array<i64: 1, 18, 18, 4>}, {transform_indices = @transform_1, window_bounds = array<i64: 3, 3, 4, 128>}, {transform_indices = @transform_2, window_bounds = array<i64: 1, 128>}, {transform_indices = @transform_3, window_bounds = array<i64: 256, 128>}]} {
    %c0 = arith.constant 0 : index
    %c0_0 = arith.constant 0 : index
    %c0_1 = arith.constant 0 : index
    %c0_2 = arith.constant 0 : index
    %0 = vector.load %arg2[%c0, %c0_0, %c0_1, %c0_2] : memref<1x18x18x4xf32, #tpu.memory_space<vmem>>, vector<1x18x18x4xf32>
    %1 = vector.shape_cast %0 : vector<1x18x18x4xf32> to vector<18x18x4xf32>
    %2 = vector.extract_strided_slice %1 {offsets = [0, 0, 0], sizes = [16, 16, 4], strides = [1, 1, 1]} : vector<18x18x4xf32> to vector<16x16x4xf32>
    %3 = vector.shape_cast %2 : vector<16x16x4xf32> to vector<256x4xf32>
    %c0_3 = arith.constant 0 : index
    %c0_4 = arith.constant 0 : index
    %c0_5 = arith.constant 0 : index
    %c0_6 = arith.constant 0 : index
    %4 = vector.load %arg3[%c0_3, %c0_4, %c0_5, %c0_6] : memref<3x3x4x128xf32, #tpu.memory_space<vmem>>, vector<1x1x4x128xf32>
    %5 = vector.shape_cast %4 : vector<1x1x4x128xf32> to vector<4x128xf32>
    %cst = arith.constant dense<0.000000e+00> : vector<256x128xf32>
    %6 = tpu.matmul %3, %5, %cst {dimension_numbers = #tpu.dot_dimension_numbers<[1], [0], [0], [1], [0, 0, 1, 1], [], []>} : vector<256x4xf32>, vector<4x128xf32>, vector<256x128xf32> -> vector<256x128xf32>
    %7 = vector.extract_strided_slice %1 {offsets = [0, 1, 0], sizes = [16, 16, 4], strides = [1, 1, 1]} : vector<18x18x4xf32> to vector<16x16x4xf32>
    %8 = vector.shape_cast %7 : vector<16x16x4xf32> to vector<256x4xf32>
    %c0_7 = arith.constant 0 : index
    %c1 = arith.constant 1 : index
    %c0_8 = arith.constant 0 : index
    %c0_9 = arith.constant 0 : index
    %9 = vector.load %arg3[%c0_7, %c1, %c0_8, %c0_9] : memref<3x3x4x128xf32, #tpu.memory_space<vmem>>, vector<1x1x4x128xf32>
    %10 = vector.shape_cast %9 : vector<1x1x4x128xf32> to vector<4x128xf32>
    %cst_10 = arith.constant dense<0.000000e+00> : vector<256x128xf32>
    %11 = tpu.matmul %8, %10, %cst_10 {dimension_numbers = #tpu.dot_dimension_numbers<[1], [0], [0], [1], [0, 0, 1, 1], [], []>} : vector<256x4xf32>, vector<4x128xf32>, vector<256x128xf32> -> vector<256x128xf32>
    %12 = arith.addf %6, %11 : vector<256x128xf32>
    %13 = vector.extract_strided_slice %1 {offsets = [0, 2, 0], sizes = [16, 16, 4], strides = [1, 1, 1]} : vector<18x18x4xf32> to vector<16x16x4xf32>
    %14 = vector.shape_cast %13 : vector<16x16x4xf32> to vector<256x4xf32>
    %c0_11 = arith.constant 0 : index
    %c2 = arith.constant 2 : index
    %c0_12 = arith.constant 0 : index
    %c0_13 = arith.constant 0 : index
    %15 = vector.load %arg3[%c0_11, %c2, %c0_12, %c0_13] : memref<3x3x4x128xf32, #tpu.memory_space<vmem>>, vector<1x1x4x128xf32>
    %16 = vector.shape_cast %15 : vector<1x1x4x128xf32> to vector<4x128xf32>
    %cst_14 = arith.constant dense<0.000000e+00> : vector<256x128xf32>
    %17 = tpu.matmul %14, %16, %cst_14 {dimension_numbers = #tpu.dot_dimension_numbers<[1], [0], [0], [1], [0, 0, 1, 1], [], []>} : vector<256x4xf32>, vector<4x128xf32>, vector<256x128xf32> -> vector<256x128xf32>
    %18 = arith.addf %12, %17 : vector<256x128xf32>
    %19 = vector.extract_strided_slice %1 {offsets = [1, 0, 0], sizes = [16, 16, 4], strides = [1, 1, 1]} : vector<18x18x4xf32> to vector<16x16x4xf32>
    %20 = vector.shape_cast %19 : vector<16x16x4xf32> to vector<256x4xf32>
    %c1_15 = arith.constant 1 : index
    %c0_16 = arith.constant 0 : index
    %c0_17 = arith.constant 0 : index
    %c0_18 = arith.constant 0 : index
    %21 = vector.load %arg3[%c1_15, %c0_16, %c0_17, %c0_18] : memref<3x3x4x128xf32, #tpu.memory_space<vmem>>, vector<1x1x4x128xf32>
    %22 = vector.shape_cast %21 : vector<1x1x4x128xf32> to vector<4x128xf32>
    %cst_19 = arith.constant dense<0.000000e+00> : vector<256x128xf32>
    %23 = tpu.matmul %20, %22, %cst_19 {dimension_numbers = #tpu.dot_dimension_numbers<[1], [0], [0], [1], [0, 0, 1, 1], [], []>} : vector<256x4xf32>, vector<4x128xf32>, vector<256x128xf32> -> vector<256x128xf32>
    %24 = arith.addf %18, %23 : vector<256x128xf32>
    %25 = vector.extract_strided_slice %1 {offsets = [1, 1, 0], sizes = [16, 16, 4], strides = [1, 1, 1]} : vector<18x18x4xf32> to vector<16x16x4xf32>
    %26 = vector.shape_cast %25 : vector<16x16x4xf32> to vector<256x4xf32>
    %c1_20 = arith.constant 1 : index
    %c1_21 = arith.constant 1 : index
    %c0_22 = arith.constant 0 : index
    %c0_23 = arith.constant 0 : index
    %27 = vector.load %arg3[%c1_20, %c1_21, %c0_22, %c0_23] : memref<3x3x4x128xf32, #tpu.memory_space<vmem>>, vector<1x1x4x128xf32>
    %28 = vector.shape_cast %27 : vector<1x1x4x128xf32> to vector<4x128xf32>
    %cst_24 = arith.constant dense<0.000000e+00> : vector<256x128xf32>
    %29 = tpu.matmul %26, %28, %cst_24 {dimension_numbers = #tpu.dot_dimension_numbers<[1], [0], [0], [1], [0, 0, 1, 1], [], []>} : vector<256x4xf32>, vector<4x128xf32>, vector<256x128xf32> -> vector<256x128xf32>
    %30 = arith.addf %24, %29 : vector<256x128xf32>
    %31 = vector.extract_strided_slice %1 {offsets = [1, 2, 0], sizes = [16, 16, 4], strides = [1, 1, 1]} : vector<18x18x4xf32> to vector<16x16x4xf32>
    %32 = vector.shape_cast %31 : vector<16x16x4xf32> to vector<256x4xf32>
    %c1_25 = arith.constant 1 : index
    %c2_26 = arith.constant 2 : index
    %c0_27 = arith.constant 0 : index
    %c0_28 = arith.constant 0 : index
    %33 = vector.load %arg3[%c1_25, %c2_26, %c0_27, %c0_28] : memref<3x3x4x128xf32, #tpu.memory_space<vmem>>, vector<1x1x4x128xf32>
    %34 = vector.shape_cast %33 : vector<1x1x4x128xf32> to vector<4x128xf32>
    %cst_29 = arith.constant dense<0.000000e+00> : vector<256x128xf32>
    %35 = tpu.matmul %32, %34, %cst_29 {dimension_numbers = #tpu.dot_dimension_numbers<[1], [0], [0], [1], [0, 0, 1, 1], [], []>} : vector<256x4xf32>, vector<4x128xf32>, vector<256x128xf32> -> vector<256x128xf32>
    %36 = arith.addf %30, %35 : vector<256x128xf32>
    %37 = vector.extract_strided_slice %1 {offsets = [2, 0, 0], sizes = [16, 16, 4], strides = [1, 1, 1]} : vector<18x18x4xf32> to vector<16x16x4xf32>
    %38 = vector.shape_cast %37 : vector<16x16x4xf32> to vector<256x4xf32>
    %c2_30 = arith.constant 2 : index
    %c0_31 = arith.constant 0 : index
    %c0_32 = arith.constant 0 : index
    %c0_33 = arith.constant 0 : index
    %39 = vector.load %arg3[%c2_30, %c0_31, %c0_32, %c0_33] : memref<3x3x4x128xf32, #tpu.memory_space<vmem>>, vector<1x1x4x128xf32>
    %40 = vector.shape_cast %39 : vector<1x1x4x128xf32> to vector<4x128xf32>
    %cst_34 = arith.constant dense<0.000000e+00> : vector<256x128xf32>
    %41 = tpu.matmul %38, %40, %cst_34 {dimension_numbers = #tpu.dot_dimension_numbers<[1], [0], [0], [1], [0, 0, 1, 1], [], []>} : vector<256x4xf32>, vector<4x128xf32>, vector<256x128xf32> -> vector<256x128xf32>
    %42 = arith.addf %36, %41 : vector<256x128xf32>
    %43 = vector.extract_strided_slice %1 {offsets = [2, 1, 0], sizes = [16, 16, 4], strides = [1, 1, 1]} : vector<18x18x4xf32> to vector<16x16x4xf32>
    %44 = vector.shape_cast %43 : vector<16x16x4xf32> to vector<256x4xf32>
    %c2_35 = arith.constant 2 : index
    %c1_36 = arith.constant 1 : index
    %c0_37 = arith.constant 0 : index
    %c0_38 = arith.constant 0 : index
    %45 = vector.load %arg3[%c2_35, %c1_36, %c0_37, %c0_38] : memref<3x3x4x128xf32, #tpu.memory_space<vmem>>, vector<1x1x4x128xf32>
    %46 = vector.shape_cast %45 : vector<1x1x4x128xf32> to vector<4x128xf32>
    %cst_39 = arith.constant dense<0.000000e+00> : vector<256x128xf32>
    %47 = tpu.matmul %44, %46, %cst_39 {dimension_numbers = #tpu.dot_dimension_numbers<[1], [0], [0], [1], [0, 0, 1, 1], [], []>} : vector<256x4xf32>, vector<4x128xf32>, vector<256x128xf32> -> vector<256x128xf32>
    %48 = arith.addf %42, %47 : vector<256x128xf32>
    %49 = vector.extract_strided_slice %1 {offsets = [2, 2, 0], sizes = [16, 16, 4], strides = [1, 1, 1]} : vector<18x18x4xf32> to vector<16x16x4xf32>
    %50 = vector.shape_cast %49 : vector<16x16x4xf32> to vector<256x4xf32>
    %c2_40 = arith.constant 2 : index
    %c2_41 = arith.constant 2 : index
    %c0_42 = arith.constant 0 : index
    %c0_43 = arith.constant 0 : index
    %51 = vector.load %arg3[%c2_40, %c2_41, %c0_42, %c0_43] : memref<3x3x4x128xf32, #tpu.memory_space<vmem>>, vector<1x1x4x128xf32>
    %52 = vector.shape_cast %51 : vector<1x1x4x128xf32> to vector<4x128xf32>
    %cst_44 = arith.constant dense<0.000000e+00> : vector<256x128xf32>
    %53 = tpu.matmul %50, %52, %cst_44 {dimension_numbers = #tpu.dot_dimension_numbers<[1], [0], [0], [1], [0, 0, 1, 1], [], []>} : vector<256x4xf32>, vector<4x128xf32>, vector<256x128xf32> -> vector<256x128xf32>
    %54 = arith.addf %48, %53 : vector<256x128xf32>
    %c0_45 = arith.constant 0 : index
    %c0_46 = arith.constant 0 : index
    %55 = vector.load %arg4[%c0_45, %c0_46] : memref<1x128xf32, #tpu.memory_space<vmem>>, vector<1x128xf32>
    %56 = vector.broadcast %55 : vector<1x128xf32> to vector<256x128xf32>
    %57 = arith.addf %54, %56 : vector<256x128xf32>
    %c0_47 = arith.constant 0 : index
    %c0_48 = arith.constant 0 : index
    %58 = vector.load %arg5[%c0_47, %c0_48] : memref<256x128xf32, #tpu.memory_space<vmem>>, vector<256x128xf32>
    tpu.vector_store %arg5[%c0_47, %c0_48], %57 {strides = array<i32>} : memref<256x128xf32, #tpu.memory_space<vmem>>, vector<256x128xf32>,
    return
  }
  func.func @transform_0(%arg0: i32, %arg1: i32) -> (i32, i32, i32, i32) {
    %c0_i32 = arith.constant 0 : i32
    %c0_i32_0 = arith.constant 0 : i32
    %c0_i32_1 = arith.constant 0 : i32
    %c0_i32_2 = arith.constant 0 : i32
    return %arg0, %c0_i32, %c0_i32_0, %c0_i32_1 : i32, i32, i32, i32
  }
  func.func @transform_1(%arg0: i32, %arg1: i32) -> (i32, i32, i32, i32) {
    %c0_i32 = arith.constant 0 : i32
    %c0_i32_0 = arith.constant 0 : i32
    %c0_i32_1 = arith.constant 0 : i32
    %c0_i32_2 = arith.constant 0 : i32
    return %c0_i32, %c0_i32_0, %c0_i32_1, %arg1 : i32, i32, i32, i32
  }
  func.func @transform_2(%arg0: i32, %arg1: i32) -> (i32, i32) {
    %c0_i32 = arith.constant 0 : i32
    %c0_i32_0 = arith.constant 0 : i32
    return %c0_i32, %arg1 : i32, i32
  }
  func.func @transform_3(%arg0: i32, %arg1: i32) -> (i32, i32) {
    %c0_i32 = arith.constant 0 : i32
    return %arg0, %arg1 : i32, i32
  }
}

</mosaic_0001>

<bundles_post_ra>
// kernel: conv2d_reflect.1
= control target key start
LH: loop header
LB: loop body
LE: loop exit
PB: predicated region body
PF: predicated region fallthrough
CT: control target
= control target key end

     0   :  { %s4333_s12 = smov 0   ;;  %s4335_s13 = smov 0   ;;  %s6023_s0 = inlined_call_operand.vmem [shape: f32[2,18,18,4], index: 0, kind: input, shape index: {}]   ;;  %s6024_s1 = inlined_call_operand.vmem [shape: f32[3,3,4,128], index: 1, kind: input, shape index: {}]   ;;  %s6025_s2 = inlined_call_operand.vmem [shape: f32[1,128], index: 2, kind: input, shape index: {}]   ;;  %s6026_s3 = inlined_call_operand.vmem [shape: f32[512,128], index: 3, kind: output, shape index: {}]  }
   0x1   :  { %s4337_s14 = smov 0  }
   0x2 LB: > { %s25_s15 = sadd.s32 1, %s4307_s13  ;;  %p3203_p0 = scmp.ge.s32.totalorder %s4311_s14, 1  ;;  %s4311_s14 = sphi %s4337_s14, %s13_s14   ;;  %s4307_s13 = sphi %s4335_s13, %s6318_s13   ;;  %s4303_s12 = sphi %s4333_s12, %s6317_s12  }
   0x3   : > { %p27_p1 = scmp.ge.s32.totalorder %s25_s15, 2  ;;  %p168_p2 = scmp.lt.s32.totalorder %s4311_s14, 3 }
   0x5   : > { %s6320_s15 = smov (%p27_p1, %s25_s15), 0  ;;  %p169_p3 = pnand %p3203_p0, %p168_p2 }
   0x7   : > { %172 = sbr.rel (%p169_p3) target bundleno = 511 (0x1ff), region = 32 }
   0xc   : > { %v3207_v0 = vld [vmem:[%s6024_s1 + $0x4] sm:$0xf]  ;;  %vm474_vm0 = vcmask 1043456   ;;  %p202_p4 = scmp.lt.s32.totalorder %s4303_s12, 1  ;;  %v277_v1 = vld [vmem:[%s6024_s1] sm:$0xf] }
   0xd   : > { %4262 = vmatprep.subr.msk.mxu1 %vm474_vm0, %v3207_v0  ;;  %3812 = vmatprep.subr.msk.mxu0 %vm474_vm0, %v3207_v0  ;;  %v3274_v2 = vld [vmem:[%s6024_s1 + $0x8] sm:$0xf]  ;;  %vm326_vm1 = vcmask 1046528   ;;  %vm409_vm2 = vcmask 31744   ;;  %v4416_v21 = vld [vmem:[%s6024_s1 + $0xc] sm:$0xf] }
   0xe   : > { %4263 = vmatpush3.msk.msra.mxu1 %vm474_vm0, %v3207_v0  ;;  %3813 = vmatpush3.msk.msra.mxu0 %vm474_vm0, %v3207_v0  ;;  %s203_s22 = scalar_select %p202_p4, %s4303_s12, 1  ;;  %v4434_v28 = vld [vmem:[%s6024_s1 + $0x10] sm:$0xf]  ;;  %vm995_vm3 = vcmask 1045504  }
   0xf   : > { %3862 = vmatprep.subr.msk.mxu1 %vm474_vm0, %v277_v1  ;;  %3912 = vmatprep.subr.msk.mxu0 %vm474_vm0, %v3274_v2  ;;  %s3205_s16 = sshll.u32 %s4303_s12, 5 }
  0x10   : > { %s4264_s23 = smul.u32 432, %s203_s22  ;;  %p215_p5 = scmp.lt.s32.totalorder %s3205_s16, 63 }
  0x12   : > { %s4373_s26 = scalar_lea.vmem %s6023_s0, %s4264_s23  ;;  %s6322_s16 = smov (!%p215_p5, %s3205_s16), 63 }
  0x13   : > { %v4376_v3 = vld [vmem:[%s4373_s26] sm:$0xff]  ;;  %v4379_v4 = vld [vmem:[%s4373_s26 + $0x8] sm:$0xff]  ;;  %v4391_v10 = vld [vmem:[%s4373_s26 + $0x10] sm:$0x3]  ;;  %s3206_s12 = sshll.u32 %s6322_s16, 3 }
  0x14   : > { %v4382_v5 = vld [vmem:[%s4373_s26 + $0xc0] sm:$0xff]  ;;  %v327_v6 = vrot.slane %v4376_v3, 1  ;;  %v328_v7 = vrot.slane %v4379_v4, 1  ;;  %v4387_v8 = vld [vmem:[%s4373_s26 + $0xc8] sm:$0xff]  ;;  %v330_v12 = vrot.slane %v4391_v10, 1  ;;  %v4399_v14 = vld [vmem:[%s4373_s26 + $0x18] sm:$0xff]  ;;  %s5867_s21 = scalar_lea.vmem %s6026_s3, %s3206_s12 }
  0x15   : > { %v367_v9 = vrot.slane %v4382_v5, 1  ;;  %v368_v11 = vrot.slane %v4387_v8, 1  ;;  %v4396_v13 = vld [vmem:[%s4373_s26 + $0xd0] sm:$0x3]  ;;  %v4404_v17 = vld [vmem:[%s4373_s26 + $0x20] sm:$0xff]  ;;  %v332_v18 = vrot.slane %v4399_v14, 1 }
  0x16   : > { %v329_v15 = vsel %vm326_vm1, %v327_v6, %v328_v7  ;;  %v370_v16 = vrot.slane %v4396_v13, 1  ;;  %v4408_v19 = vld [vmem:[%s4373_s26 + $0xd8] sm:$0xff]  ;;  %v4411_v20 = vld [vmem:[%s4373_s26 + $0xe0] sm:$0xff]  ;;  %v331_v23 = vsel %vm326_vm1, %v328_v7, %v330_v12  ;;  %v333_v24 = vrot.slane %v4404_v17, 1  ;;  %v4426_v26 = vld [vmem:[%s4373_s26 + $0x28] sm:$0x3] }
  0x17   : > { %3814 = vmatprep.mubr.msk.f32.mxu0 %vm409_vm2, %v329_v15  ;;  %v4420_v22 = vsel %vm326_vm1, %v367_v9, %v368_v11  ;;  %v372_v25 = vrot.slane %v4408_v19, 1  ;;  %v4429_v27 = vld [vmem:[%s4373_s26 + $0xe8] sm:$0x3]  ;;  %v373_v30 = vrot.slane %v4411_v20, 1  ;;  %v335_v31 = vrot.slane %v4426_v26, 1  ;;  %v4446_v33 = vld [vmem:[%s4373_s26 + $0x30] sm:$0xff] }
  0x18   : > { %6109 = vst [vmem:[#allocation2_spill] sm:$0xff] %v4420_v22  ;;  %3838 = vmatprep.mubr.msk.f32.mxu1 %vm409_vm2, %v4420_v22  ;;  %3815 = vmatmul.mubr.msk.f32.vlgmr.msra.gmra.mxu0 %vm409_vm2, %v331_v23  ;;  %v4440_v29 = vsel %vm326_vm1, %v368_v11, %v370_v16  ;;  %v375_v32 = vrot.slane %v4429_v27, 1  ;;  %v4449_v34 = vld [vmem:[%s4373_s26 + $0x38] sm:$0xff]  ;;  %v4452_v35 = vld [vmem:[%s4373_s26 + $0xf0] sm:$0xff]  ;;  %v4458_v36 = vsel %vm326_vm1, %v332_v18, %v333_v24  ;;  %v337_v37 = vrot.slane %v4446_v33, 1  ;;  %v4486_v47 = vld [vmem:[%s4373_s26 + $0x48] sm:$0xff] }
  0x19   : > { %6110 = vst [vmem:[#allocation3_spill] sm:$0xff] %v4440_v29  ;;  %3839 = vmatmul.mubr.msk.f32.vlgmr.msra.gmra.mxu1 %vm409_vm2, %v4440_v29  ;;  %3913 = vmatpush3.msk.msra.mxu0 %vm474_vm0, %v3274_v2  ;;  %6111 = vst [vmem:[#allocation4_spill] sm:$0xff] %v4458_v36  ;;  %v338_v38 = vrot.slane %v4449_v34, 1  ;;  %v4463_v39 = vld [vmem:[%s4373_s26 + $0xf8] sm:$0xff]  ;;  %v377_v40 = vrot.slane %v4452_v35, 1  ;;  %v4473_v42 = vsel %vm326_vm1, %v372_v25, %v373_v30  ;;  %v4489_v48 = vld [vmem:[%s4373_s26 + $0x50] sm:$0xff] }
  0x1a   : > { %v4467_v41 = vld [vmem:[%s4373_s26 + $0x40] sm:$0x3]  ;;  %3863 = vmatpush3.msk.msra.mxu1 %vm474_vm0, %v277_v1  ;;  %3817 = vmatprep.mubr.msk.f32.mxu0 %vm409_vm2, %v4458_v36  ;;  %6112 = vst [vmem:[#allocation5_spill] sm:$0xff] %v4473_v42  ;;  %v4476_v43 = vsel %vm326_vm1, %v333_v24, %v335_v31  ;;  %v4479_v44 = vsel %vm326_vm1, %v373_v30, %v375_v32  ;;  %v378_v45 = vrot.slane %v4463_v39, 1  ;;  %v342_v52 = vrot.slane %v4486_v47, 1  ;;  %v4500_v53 = vld [vmem:[%s4373_s26 + $0x108] sm:$0xff] }
  0x1b   : > { %6113 = vst [vmem:[#allocation6_spill] sm:$0xff] %v4476_v43  ;;  %6114 = vst [vmem:[#allocation7_spill] sm:$0xff] %v4479_v44  ;;  %v4483_v46 = vld [vmem:[%s4373_s26 + $0x100] sm:$0x3]  ;;  %3841 = vmatprep.mubr.msk.f32.mxu1 %vm409_vm2, %v4473_v42  ;;  %v4494_v49 = vsel %vm326_vm1, %v337_v37, %v338_v38  ;;  %v340_v50 = vrot.slane %v4467_v41, 1  ;;  %v4503_v54 = vld [vmem:[%s4373_s26 + $0x110] sm:$0xff]  ;;  %3962 = vmatprep.subr.msk.mxu1 %vm474_vm0, %v4416_v21 }
  0x1c   : > { %6115 = vst [vmem:[#allocation8_spill] sm:$0xff] %v4494_v49  ;;  %v380_v51 = vrot.slane %v4483_v46, 1  ;;  %v4506_v55 = vld [vmem:[%s4373_s26 + $0x60] sm:$0xff]  ;;  %3818 = vmatmul.mubr.msk.f32.gmra.mxu0 %vm409_vm2, %v4476_v43  ;;  %v4513_v56 = vsel %vm326_vm1, %v377_v40, %v378_v45  ;;  %v343_v57 = vrot.slane %v4489_v48, 1  ;;  %v382_v58 = vrot.slane %v4500_v53, 1  ;;  %v4522_v61 = vld [vmem:[%s4373_s26 + $0x68] sm:$0xff]  ;;  %4012 = vmatprep.subr.msk.mxu0 %vm474_vm0, %v4434_v28 }
  0x1d   : > { %6116 = vst [vmem:[#allocation9_spill] sm:$0xff] %v4513_v56  ;;  %v383_v59 = vrot.slane %v4503_v54, 1  ;;  %v4519_v60 = vld [vmem:[%s4373_s26 + $0x58] sm:$0x3]  ;;  %3842 = vmatmul.mubr.msk.f32.gmra.mxu1 %vm409_vm2, %v4479_v44  ;;  %3820 = vmatprep.mubr.msk.f32.mxu0 %vm409_vm2, %v4494_v49  ;;  %v4531_v62 = vsel %vm326_vm1, %v338_v38, %v340_v50  ;;  %v347_v1 = vrot.slane %v4506_v55, 1  ;;  %v4539_v2 = vld [vmem:[%s4373_s26 + $0x120] sm:$0xff] }
  0x1e   : > { %6117 = vst [vmem:[#allocation10_spill] sm:$0xff] %v4531_v62  ;;  %v345_v63 = vrot.slane %v4519_v60, 1  ;;  %v4535_v0 = vld [vmem:[%s4373_s26 + $0x118] sm:$0x3]  ;;  %v4542_v6 = vld [vmem:[%s4373_s26 + $0x128] sm:$0xff]  ;;  %3844 = vmatprep.mubr.msk.f32.mxu1 %vm409_vm2, %v4513_v56  ;;  %v4547_v7 = vsel %vm326_vm1, %v378_v45, %v380_v51  ;;  %v4550_v9 = vsel %vm326_vm1, %v342_v52, %v343_v57  ;;  %v348_v12 = vrot.slane %v4522_v61, 1 }
  0x1f   : > { %6118 = vst [vmem:[#allocation11_spill] sm:$0xff] %v4547_v7  ;;  %6119 = vst [vmem:[#allocation12_spill] sm:$0xff] %v4550_v9  ;;  %v385_v11 = vrot.slane %v4535_v0, 1  ;;  %v4555_v15 = vld [vmem:[%s4373_s26 + $0x70] sm:$0x3]  ;;  %v4561_v18 = vsel %vm326_vm1, %v382_v58, %v383_v59  ;;  %v387_v23 = vrot.slane %v4539_v2, 1 }
  0x20   : > { %v4558_v16 = vld [vmem:[%s4373_s26 + $0x130] sm:$0x3]  ;;  %6120 = vst [vmem:[#allocation13_spill] sm:$0xff] %v4561_v18  ;;  %v388_v24 = vrot.slane %v4542_v6, 1  ;;  %v4566_v25 = vld [vmem:[%s4373_s26 + $0x78] sm:$0xff]  ;;  %v4569_v30 = vld [vmem:[%s4373_s26 + $0x80] sm:$0xff]  ;;  %3821 = vmatmul.mubr.msk.f32.gmra.mxu0 %vm409_vm2, %v4531_v62  ;;  %v4584_v37 = vsel %vm326_vm1, %v343_v57, %v345_v63  ;;  %v4594_v50 = vsel %vm326_vm1, %v347_v1, %v348_v12 }
  0x21   : > { %v4574_v31 = vld [vmem:[%s4373_s26 + $0x138] sm:$0xff]  ;;  %v4577_v32 = vld [vmem:[%s4373_s26 + $0x140] sm:$0xff]  ;;  %3845 = vmatmul.mubr.msk.f32.gmra.mxu1 %vm409_vm2, %v4547_v7  ;;  %3823 = vmatprep.mubr.msk.f32.mxu0 %vm409_vm2, %v4550_v9  ;;  %6121 = vst [vmem:[#allocation14_spill] sm:$0xff] %v4584_v37  ;;  %v350_v38 = vrot.slane %v4555_v15, 1  ;;  %v390_v40 = vrot.slane %v4558_v16, 1  ;;  %v4591_v45 = vsel %vm326_vm1, %v383_v59, %v385_v11  ;;  %6123 = vst [vmem:[#allocation16_spill] sm:$0xff] %v4594_v50 }
  0x22   : > { %3847 = vmatprep.mubr.msk.f32.mxu1 %vm409_vm2, %v4561_v18  ;;  %6122 = vst [vmem:[#allocation15_spill] sm:$0xff] %v4591_v45  ;;  %v352_v51 = vrot.slane %v4566_v25, 1  ;;  %v353_v52 = vrot.slane %v4569_v30, 1  ;;  %v4599_v57 = vld [vmem:[%s4373_s26 + $0x88] sm:$0x3]  ;;  %v4605_v63 = vsel %vm326_vm1, %v387_v23, %v388_v24  ;;  %v392_v7 = vrot.slane %v4574_v31, 1 }
  0x23   : > { %v4602_v58 = vld [vmem:[%s4373_s26 + $0x148] sm:$0x3]  ;;  %6124 = vst [vmem:[#allocation17_spill] sm:$0xff] %v4605_v63  ;;  %v393_v18 = vrot.slane %v4577_v32, 1  ;;  %v4610_v59 = vld [vmem:[%s4373_s26 + $0x90] sm:$0xff]  ;;  %v4613_v1 = vld [vmem:[%s4373_s26 + $0x98] sm:$0xff]  ;;  %v4628_v23 = vsel %vm326_vm1, %v348_v12, %v350_v38  ;;  %v4635_v29 = vsel %vm326_vm1, %v388_v24, %v390_v40 }
  0x24   : > { %3824 = vmatmul.mubr.msk.f32.gmra.mxu0 %vm409_vm2, %v4584_v37  ;;  %v4618_v11 = vld [vmem:[%s4373_s26 + $0x150] sm:$0xff]  ;;  %v4621_v56 = vld [vmem:[%s4373_s26 + $0x158] sm:$0xff]  ;;  %6126 = vst [vmem:[#allocation19_spill] sm:$0xff] %v4628_v23  ;;  %v355_v44 = vrot.slane %v4599_v57, 1  ;;  %v395_v42 = vrot.slane %v4602_v58, 1  ;;  %6127 = vst [vmem:[#allocation20_spill] sm:$0xff] %v4635_v29 }
  0x25   : > { %6125 = vst [vmem:[#allocation18_spill] sm:$0xff] %v4621_v56  ;;  %3848 = vmatmul.mubr.msk.f32.gmra.mxu1 %vm409_vm2, %v4591_v45  ;;  %3826 = vmatprep.mubr.msk.f32.mxu0 %vm409_vm2, %v4594_v50  ;;  %v4638_v45 = vsel %vm326_vm1, %v352_v51, %v353_v52  ;;  %v357_v22 = vrot.slane %v4610_v59, 1  ;;  %v358_v12 = vrot.slane %v4613_v1, 1  ;;  %v4643_v38 = vld [vmem:[%s4373_s26 + $0xa0] sm:$0x3]  ;;  %v4646_v50 = vsel %vm326_vm1, %v392_v7, %v393_v18  ;;  %v4654_v24 = vld [vmem:[%s4373_s26 + $0xa8] sm:$0xff] }
  0x26   : > { %3850 = vmatprep.mubr.msk.f32.mxu1 %vm409_vm2, %v4605_v63  ;;  %6128 = vst [vmem:[#allocation21_spill] sm:$0xff] %v4638_v45  ;;  %6129 = vst [vmem:[#allocation22_spill] sm:$0xff] %v4646_v50  ;;  %v397_v37 = vrot.slane %v4618_v11, 1  ;;  %v398_v9 = vrot.slane %v4621_v56, 1  ;;  %v4651_v63 = vld [vmem:[%s4373_s26 + $0x160] sm:$0x3]  ;;  %v4672_v7 = vsel %vm326_vm1, %v353_v52, %v355_v44  ;;  %v4675_v49 = vsel %vm326_vm1, %v393_v18, %v395_v42 }
  0x27   : > { %v4657_v40 = vld [vmem:[%s4373_s26 + $0xb0] sm:$0xff]  ;;  %v4662_v51 = vld [vmem:[%s4373_s26 + $0x168] sm:$0xff]  ;;  %6131 = vst [vmem:[#allocation24_spill] sm:$0xff] %v4672_v7  ;;  %6132 = vst [vmem:[#allocation25_spill] sm:$0xff] %v4675_v49  ;;  %v360_v43 = vrot.slane %v4643_v38, 1  ;;  %v400_v36 = vrot.slane %v4651_v63, 1 }
  0x28   : > { %3827 = vmatmul.mubr.msk.f32.gmra.mxu0 %vm409_vm2, %v4628_v23  ;;  %v4665_v62 = vld [vmem:[%s4373_s26 + $0x170] sm:$0xff]  ;;  %v4681_v23 = vsel %vm326_vm1, %v357_v22, %v358_v12  ;;  %v4687_v56 = vld [vmem:[%s4373_s26 + $0xb8] sm:$0x3]  ;;  %v4690_v44 = vsel %vm326_vm1, %v397_v37, %v398_v9  ;;  %v402_v42 = vrot.slane %v4662_v51, 1 }
  0x29   : > { %6130 = vst [vmem:[#allocation23_spill] sm:$0xff] %v4665_v62  ;;  %3851 = vmatmul.mubr.msk.f32.gmra.mxu1 %vm409_vm2, %v4635_v29  ;;  %3829 = vmatprep.mubr.msk.f32.mxu0 %vm409_vm2, %v4638_v45  ;;  %6133 = vst [vmem:[#allocation26_spill] sm:$0xff] %v4681_v23  ;;  %v362_v29 = vrot.slane %v4654_v24, 1  ;;  %v363_v45 = vrot.slane %v4657_v40, 1  ;;  %v403_v18 = vrot.slane %v4665_v62, 1  ;;  %v4704_v22 = vsel %vm326_vm1, %v358_v12, %v360_v43 }
  0x2a   : > { %3853 = vmatprep.mubr.msk.f32.mxu1 %vm409_vm2, %v4646_v50  ;;  %6134 = vst [vmem:[#allocation27_spill] sm:$0xff] %v4690_v44  ;;  %v4695_v52 = vld [vmem:[%s4373_s26 + $0x178] sm:$0x3]  ;;  %6135 = vst [vmem:[#allocation28_spill] sm:$0xff] %v4704_v22  ;;  %v365_v37 = vrot.slane %v4687_v56, 1  ;;  %v996_v50 = vrot.slane %v4376_v3, 2  ;;  %v4711_v62 = vsel %vm326_vm1, %v398_v9, %v400_v36 }
  0x2b   : > { %6136 = vst [vmem:[#allocation29_spill] sm:$0xff] %v4711_v62  ;;  %v4719_v43 = vsel %vm326_vm1, %v402_v42, %v403_v18  ;;  %v999_v12 = vrot.slane %v4391_v10, 2  ;;  %v1001_v10 = vrot.slane %v4399_v14, 2  ;;  %v1002_v42 = vrot.slane %v4404_v17, 2 }
  0x2c   : > { %3830 = vmatmul.mubr.msk.f32.gmra.mxu0 %vm409_vm2, %v4672_v7  ;;  %v4714_v7 = vsel %vm326_vm1, %v362_v29, %v363_v45  ;;  %6138 = vst [vmem:[#allocation31_spill] sm:$0xff] %v4719_v43  ;;  %v4729_v29 = vsel %vm326_vm1, %v363_v45, %v365_v37  ;;  %v1004_v37 = vrot.slane %v4426_v26, 2  ;;  %v1009_v26 = vrot.slane %v4467_v41, 2 }
  0x2d   : > { %3854 = vmatmul.mubr.msk.f32.gmra.mxu1 %vm409_vm2, %v4675_v49  ;;  %3832 = vmatprep.mubr.msk.f32.mxu0 %vm409_vm2, %v4681_v23  ;;  %6137 = vst [vmem:[#allocation30_spill] sm:$0xff] %v4714_v7  ;;  %v405_v49 = vrot.slane %v4695_v52, 1  ;;  %v997_v23 = vrot.slane %v4379_v4, 2  ;;  %6139 = vst [vmem:[#allocation32_spill] sm:$0xff] %v4729_v29  ;;  %v1014_v41 = vrot.slane %v4519_v60, 2 }
  0x2e   : > { %3856 = vmatprep.mubr.msk.f32.mxu1 %vm409_vm2, %v4690_v44 }
  0x2f   : > { %v4734_v36 = vsel %vm326_vm1, %v403_v18, %v405_v49  ;;  %v998_v9 = vsel %vm995_vm3, %v996_v50, %v997_v23  ;;  %v1000_v45 = vsel %vm995_vm3, %v997_v23, %v999_v12  ;;  %v1006_v49 = vrot.slane %v4446_v33, 2  ;;  %v4770_v23 = vld [vmem:[%s6024_s1 + $0x18] sm:$0xf] }
  0x30   : > { %3833 = vmatmul.mubr.msk.f32.gmra.mxu0 %vm409_vm2, %v4704_v22  ;;  %6140 = vst [vmem:[#allocation33_spill] sm:$0xff] %v4734_v36  ;;  %v1007_v50 = vrot.slane %v4449_v34, 2  ;;  %v4752_v18 = vsel %vm995_vm3, %v1001_v10, %v1002_v42  ;;  %v1012_v12 = vrot.slane %v4489_v48, 2 }
  0x31   : > { %3857 = vmatmul.mubr.msk.f32.gmra.mxu1 %vm409_vm2, %v4711_v62  ;;  %3835 = vmatprep.mubr.msk.f32.mxu0 %vm409_vm2, %v4714_v7 }
  0x32   : > { %3859 = vmatprep.mubr.msk.f32.mxu1 %vm409_vm2, %v4719_v43  ;;  %v4811_v60 = vsel %vm995_vm3, %v1012_v12, %v1014_v41  ;;  %v1026_v41 = vrot.slane %v4610_v59, 2 }
  0x34   : > { %3836 = vmatmul.mubr.msk.f32.gmra.mxu0 %vm409_vm2, %v4729_v29 }
  0x35   : > { %3860 = vmatmul.mubr.msk.f32.gmra.mxu1 %vm409_vm2, %v4734_v36  ;;  %3914 = vmatprep.mubr.msk.f32.mxu0 %vm409_vm2, %v998_v9  ;;  %v4757_v9 = vld [vmem:[%s6024_s1 + $0x14] sm:$0xf] }
  0x36   : > { %3864 = vmatprep.mubr.msk.f32.mxu1 %vm409_vm2, %v4376_v3  ;;  %v4764_v3 = vsel %vm995_vm3, %v1002_v42, %v1004_v37  ;;  %v1016_v42 = vrot.slane %v4506_v55, 2  ;;  %v1019_v37 = vrot.slane %v4555_v15, 2 }
  0x38   : > { %3915 = vmatmul.mubr.msk.f32.vlgmr.msra.gmra.mxu0 %vm409_vm2, %v1000_v45  ;;  %v1017_v45 = vrot.slane %v4522_v61, 2 }
  0x39   : > { %3865 = vmatmul.mubr.msk.f32.vlgmr.msra.gmra.mxu1 %vm409_vm2, %v4379_v4  ;;  %4013 = vmatpush3.msk.msra.mxu0 %vm474_vm0, %v4434_v28  ;;  %v4777_v4 = vsel %vm995_vm3, %v1006_v49, %v1007_v50  ;;  %v1011_v28 = vrot.slane %v4486_v47, 2 }
  0x3a   : > { %3963 = vmatpush3.msk.msra.mxu1 %vm474_vm0, %v4416_v21  ;;  %3867 = vmatprep.mubr.msk.f32.mxu1 %vm409_vm2, %v4399_v14  ;;  %v4794_v21 = vsel %vm995_vm3, %v1007_v50, %v1009_v26  ;;  %v4817_v49 = vsel %vm995_vm3, %v1016_v42, %v1017_v45  ;;  %v1021_v50 = vrot.slane %v4566_v25, 2  ;;  %v1022_v26 = vrot.slane %v4569_v30, 2 }
  0x3b   : > { %3917 = vmatprep.mubr.msk.f32.mxu0 %vm409_vm2, %v4752_v18  ;;  %4062 = vmatprep.subr.msk.mxu1 %vm474_vm0, %v4757_v9  ;;  %v4800_v10 = vsel %vm995_vm3, %v1011_v28, %v1012_v12  ;;  %v4828_v15 = vsel %vm995_vm3, %v1017_v45, %v1019_v37  ;;  %v1024_v28 = vrot.slane %v4599_v57, 2  ;;  %v1027_v42 = vrot.slane %v4613_v1, 2 }
  0x3c   : > { %3918 = vmatmul.mubr.msk.f32.gmra.mxu0 %vm409_vm2, %v4764_v3  ;;  %4112 = vmatprep.subr.msk.mxu0 %vm474_vm0, %v4770_v23  ;;  %6141 = vst [vmem:[#allocation34_spill] sm:$0xff] %v4828_v15  ;;  %v4834_v12 = vsel %vm995_vm3, %v1021_v50, %v1022_v26  ;;  %v1029_v45 = vrot.slane %v4643_v38, 2  ;;  %v1031_v50 = vrot.slane %v4654_v24, 2 }
  0x3d   : > { %3868 = vmatmul.mubr.msk.f32.gmra.mxu1 %vm409_vm2, %v4404_v17  ;;  %3920 = vmatprep.mubr.msk.f32.mxu0 %vm409_vm2, %v4777_v4  ;;  %v4845_v57 = vsel %vm995_vm3, %v1022_v26, %v1024_v28  ;;  %v4851_v37 = vsel %vm995_vm3, %v1026_v41, %v1027_v42  ;;  %v1034_v26 = vrot.slane %v4687_v56, 2  ;;  %v1036_v41 = vrot.slane %v4382_v5, 2 }
  0x3e   : > { %3870 = vmatprep.mubr.msk.f32.mxu1 %vm409_vm2, %v4446_v33  ;;  %6142 = vst [vmem:[#allocation35_spill] sm:$0xff] %v4845_v57  ;;  %v4862_v38 = vsel %vm995_vm3, %v1027_v42, %v1029_v45  ;;  %v1039_v42 = vrot.slane %v4396_v13, 2 }
  0x3f   : > { %6143 = vst [vmem:[#allocation36_spill] sm:$0xff] %v4862_v38 }
  0x40   : > { %3921 = vmatmul.mubr.msk.f32.gmra.mxu0 %vm409_vm2, %v4794_v21 }
  0x41   : > { %3871 = vmatmul.mubr.msk.f32.gmra.mxu1 %vm409_vm2, %v4449_v34  ;;  %3923 = vmatprep.mubr.msk.f32.mxu0 %vm409_vm2, %v4800_v10 }
  0x42   : > { %3873 = vmatprep.mubr.msk.f32.mxu1 %vm409_vm2, %v4486_v47 }
  0x44   : > { %3924 = vmatmul.mubr.msk.f32.gmra.mxu0 %vm409_vm2, %v4811_v60 }
  0x45   : > { %3874 = vmatmul.mubr.msk.f32.gmra.mxu1 %vm409_vm2, %v4489_v48  ;;  %3926 = vmatprep.mubr.msk.f32.mxu0 %vm409_vm2, %v4817_v49 }
  0x46   : > { %3876 = vmatprep.mubr.msk.f32.mxu1 %vm409_vm2, %v4506_v55 }
  0x48   : > { %3927 = vmatmul.mubr.msk.f32.gmra.mxu0 %vm409_vm2, %v4828_v15  ;;  %v1032_v15 = vrot.slane %v4657_v40, 2 }
  0x49   : > { %3877 = vmatmul.mubr.msk.f32.gmra.mxu1 %vm409_vm2, %v4522_v61  ;;  %3929 = vmatprep.mubr.msk.f32.mxu0 %vm409_vm2, %v4834_v12 }
  0x4a   : > { %3879 = vmatprep.mubr.msk.f32.mxu1 %vm409_vm2, %v4566_v25  ;;  %v4868_v28 = vsel %vm995_vm3, %v1031_v50, %v1032_v15  ;;  %v4879_v56 = vsel %vm995_vm3, %v1032_v15, %v1034_v26  ;;  %v1041_v50 = vrot.slane %v4408_v19, 2  ;;  %v1044_v15 = vrot.slane %v4429_v27, 2 }
  0x4b   : > { %6144 = vst [vmem:[#allocation37_spill] sm:$0xff] %v4879_v56 }
  0x4c   : > { %3930 = vmatmul.mubr.msk.f32.gmra.mxu0 %vm409_vm2, %v4845_v57  ;;  %v1037_v57 = vrot.slane %v4387_v8, 2 }
  0x4d   : > { %3880 = vmatmul.mubr.msk.f32.gmra.mxu1 %vm409_vm2, %v4569_v30  ;;  %3932 = vmatprep.mubr.msk.f32.mxu0 %vm409_vm2, %v4851_v37 }
  0x4e   : > { %3882 = vmatprep.mubr.msk.f32.mxu1 %vm409_vm2, %v4610_v59  ;;  %v4885_v45 = vsel %vm995_vm3, %v1036_v41, %v1037_v57  ;;  %v4896_v13 = vsel %vm995_vm3, %v1037_v57, %v1039_v42  ;;  %v1046_v41 = vrot.slane %v4452_v35, 2  ;;  %v1049_v57 = vrot.slane %v4483_v46, 2 }
  0x4f   : > { %6145 = vst [vmem:[#allocation38_spill] sm:$0xff] %v4896_v13 }
  0x50   : > { %3933 = vmatmul.mubr.msk.f32.gmra.mxu0 %vm409_vm2, %v4862_v38  ;;  %v1042_v38 = vrot.slane %v4411_v20, 2 }
  0x51   : > { %3883 = vmatmul.mubr.msk.f32.gmra.mxu1 %vm409_vm2, %v4613_v1  ;;  %3935 = vmatprep.mubr.msk.f32.mxu0 %vm409_vm2, %v4868_v28 }
  0x52   : > { %3885 = vmatprep.mubr.msk.f32.mxu1 %vm409_vm2, %v4654_v24  ;;  %v4902_v26 = vsel %vm995_vm3, %v1041_v50, %v1042_v38  ;;  %v4913_v27 = vsel %vm995_vm3, %v1042_v38, %v1044_v15  ;;  %v1051_v50 = vrot.slane %v4500_v53, 2  ;;  %v1054_v38 = vrot.slane %v4535_v0, 2 }
  0x53   : > { %6146 = vst [vmem:[#allocation39_spill] sm:$0xff] %v4913_v27 }
  0x54   : > { %3936 = vmatmul.mubr.msk.f32.gmra.mxu0 %vm409_vm2, %v4879_v56  ;;  %v1047_v56 = vrot.slane %v4463_v39, 2 }
  0x55   : > { %3886 = vmatmul.mubr.msk.f32.gmra.mxu1 %vm409_vm2, %v4657_v40  ;;  %3938 = vmatprep.mubr.msk.f32.mxu0 %vm409_vm2, %v4885_v45 }
  0x56   : > { %3888 = vmatprep.mubr.msk.f32.mxu1 %vm409_vm2, %v4382_v5  ;;  %v4919_v42 = vsel %vm995_vm3, %v1046_v41, %v1047_v56  ;;  %v4930_v46 = vsel %vm995_vm3, %v1047_v56, %v1049_v57  ;;  %v1056_v41 = vrot.slane %v4539_v2, 2  ;;  %v1059_v56 = vrot.slane %v4558_v16, 2 }
  0x57   : > { %6147 = vst [vmem:[#allocation40_spill] sm:$0xff] %v4930_v46 }
  0x58   : > { %3939 = vmatmul.mubr.msk.f32.gmra.mxu0 %vm409_vm2, %v4896_v13  ;;  %v1052_v13 = vrot.slane %v4503_v54, 2 }
  0x59   : > { %3889 = vmatmul.mubr.msk.f32.gmra.mxu1 %vm409_vm2, %v4387_v8  ;;  %3941 = vmatprep.mubr.msk.f32.mxu0 %vm409_vm2, %v4902_v26 }
  0x5a   : > { %3891 = vmatprep.mubr.msk.f32.mxu1 %vm409_vm2, %v4408_v19  ;;  %v4936_v15 = vsel %vm995_vm3, %v1051_v50, %v1052_v13  ;;  %v4947_v0 = vsel %vm995_vm3, %v1052_v13, %v1054_v38  ;;  %v1061_v50 = vrot.slane %v4574_v31, 2  ;;  %v1064_v13 = vrot.slane %v4602_v58, 2 }
  0x5b   : > { %6148 = vst [vmem:[#allocation41_spill] sm:$0xff] %v4936_v15  ;;  %6149 = vst [vmem:[#allocation42_spill] sm:$0xff] %v4947_v0 }
  0x5c   : > { %3942 = vmatmul.mubr.msk.f32.gmra.mxu0 %vm409_vm2, %v4913_v27  ;;  %v1057_v27 = vrot.slane %v4542_v6, 2 }
  0x5d   : > { %3892 = vmatmul.mubr.msk.f32.gmra.mxu1 %vm409_vm2, %v4411_v20  ;;  %3944 = vmatprep.mubr.msk.f32.mxu0 %vm409_vm2, %v4919_v42 }
  0x5e   : > { %3894 = vmatprep.mubr.msk.f32.mxu1 %vm409_vm2, %v4452_v35  ;;  %v4953_v57 = vsel %vm995_vm3, %v1056_v41, %v1057_v27  ;;  %v4964_v16 = vsel %vm995_vm3, %v1057_v27, %v1059_v56  ;;  %v1066_v41 = vrot.slane %v4618_v11, 2  ;;  %v1069_v27 = vrot.slane %v4651_v63, 2 }
  0x5f   : > { %6150 = vst [vmem:[#allocation43_spill] sm:$0xff] %v4953_v57  ;;  %6151 = vst [vmem:[#allocation44_spill] sm:$0xff] %v4964_v16 }
  0x60   : > { %3945 = vmatmul.mubr.msk.f32.gmra.mxu0 %vm409_vm2, %v4930_v46  ;;  %v1062_v46 = vrot.slane %v4577_v32, 2 }
  0x61   : > { %3895 = vmatmul.mubr.msk.f32.gmra.mxu1 %vm409_vm2, %v4463_v39  ;;  %3947 = vmatprep.mubr.msk.f32.mxu0 %vm409_vm2, %v4936_v15 }
  0x62   : > { %3897 = vmatprep.mubr.msk.f32.mxu1 %vm409_vm2, %v4500_v53  ;;  %v4970_v38 = vsel %vm995_vm3, %v1061_v50, %v1062_v46  ;;  %v4981_v58 = vsel %vm995_vm3, %v1062_v46, %v1064_v13  ;;  %v1071_v50 = vrot.slane %v4662_v51, 2  ;;  %v1074_v46 = vrot.slane %v4695_v52, 2  ;;  %v6155_v52 = vld [vmem:[#allocation4_spill] sm:$0xff] }
  0x64   : > { %3948 = vmatmul.mubr.msk.f32.gmra.mxu0 %vm409_vm2, %v4947_v0  ;;  %v6152_v0 = vld [vmem:[#allocation18_spill] sm:$0xff] }
  0x65   : > { %3898 = vmatmul.mubr.msk.f32.gmra.mxu1 %vm409_vm2, %v4503_v54  ;;  %3950 = vmatprep.mubr.msk.f32.mxu0 %vm409_vm2, %v4953_v57  ;;  %v1067_v15 = vrot.slane %v6152_v0, 2 }
  0x66   : > { %3900 = vmatprep.mubr.msk.f32.mxu1 %vm409_vm2, %v4539_v2 }
  0x67   : > { %v4987_v56 = vsel %vm995_vm3, %v1066_v41, %v1067_v15  ;;  %v4998_v63 = vsel %vm995_vm3, %v1067_v15, %v1069_v27  ;;  %v6156_v41 = vld [vmem:[#allocation6_spill] sm:$0xff] }
  0x68   : > { %3951 = vmatmul.mubr.msk.f32.gmra.mxu0 %vm409_vm2, %v4964_v16  ;;  %v6153_v16 = vld [vmem:[#allocation23_spill] sm:$0xff]  ;;  %v5039_v27 = vld [vmem:[%s6024_s1 + $0x20] sm:$0xf] }
  0x69   : > { %3901 = vmatmul.mubr.msk.f32.gmra.mxu1 %vm409_vm2, %v4542_v6  ;;  %3953 = vmatprep.mubr.msk.f32.mxu0 %vm409_vm2, %v4970_v38  ;;  %v1072_v57 = vrot.slane %v6153_v16, 2 }
  0x6a   : > { %3903 = vmatprep.mubr.msk.f32.mxu1 %vm409_vm2, %v4574_v31 }
  0x6b   : > { %v5004_v13 = vsel %vm995_vm3, %v1071_v50, %v1072_v57  ;;  %v5013_v15 = vsel %vm995_vm3, %v1072_v57, %v1074_v46  ;;  %v5030_v57 = vld [vmem:[%s6024_s1 + $0x1c] sm:$0xf]  ;;  %v6161_v50 = vld [vmem:[#allocation16_spill] sm:$0xff]  ;;  %v6162_v46 = vld [vmem:[#allocation19_spill] sm:$0xff] }
  0x6c   : > { %3954 = vmatmul.mubr.msk.f32.gmra.mxu0 %vm409_vm2, %v4981_v58  ;;  %6154 = vst [vmem:[#allocation18_spill] sm:$0xff] %v5013_v15 }
  0x6d   : > { %3904 = vmatmul.mubr.msk.f32.gmra.mxu1 %vm409_vm2, %v4577_v32  ;;  %3956 = vmatprep.mubr.msk.f32.mxu0 %vm409_vm2, %v4987_v56 }
  0x6e   : > { %3906 = vmatprep.mubr.msk.f32.mxu1 %vm409_vm2, %v4618_v11 }
  0x70   : > { %3957 = vmatmul.mubr.msk.f32.gmra.mxu0 %vm409_vm2, %v4998_v63 }
  0x71   : > { %3907 = vmatmul.mubr.msk.f32.gmra.mxu1 %vm409_vm2, %v6152_v0  ;;  %3959 = vmatprep.mubr.msk.f32.mxu0 %vm409_vm2, %v5004_v13 }
  0x72   : > { %3909 = vmatprep.mubr.msk.f32.mxu1 %vm409_vm2, %v4662_v51 }
  0x74   : > { %3960 = vmatmul.mubr.msk.f32.gmra.mxu0 %vm409_vm2, %v5013_v15 }
  0x75   : > { %3910 = vmatmul.mubr.msk.f32.gmra.mxu1 %vm409_vm2, %v6153_v16  ;;  %4014 = vmatprep.mubr.msk.f32.mxu0 %vm409_vm2, %v6155_v52  ;;  %v6163_v52 = vld [vmem:[#allocation21_spill] sm:$0xff] }
  0x76   : > { %3964 = vmatprep.mubr.msk.f32.mxu1 %vm409_vm2, %v4399_v14  ;;  %v6157_v14 = vld [vmem:[#allocation8_spill] sm:$0xff] }
  0x78   : > { %4015 = vmatmul.mubr.msk.f32.vlgmr.msra.gmra.mxu0 %vm409_vm2, %v6156_v41  ;;  %v6164_v41 = vld [vmem:[#allocation24_spill] sm:$0xff] }
  0x79   : > { %3965 = vmatmul.mubr.msk.f32.vlgmr.msra.gmra.mxu1 %vm409_vm2, %v4404_v17  ;;  %4113 = vmatpush3.msk.msra.mxu0 %vm474_vm0, %v4770_v23  ;;  %v6158_v17 = vld [vmem:[#allocation10_spill] sm:$0xff]  ;;  %v6159_v23 = vld [vmem:[#allocation12_spill] sm:$0xff] }
  0x7a   : > { %4063 = vmatpush3.msk.msra.mxu1 %vm474_vm0, %v4757_v9  ;;  %3967 = vmatprep.mubr.msk.f32.mxu1 %vm409_vm2, %v4446_v33  ;;  %v6160_v9 = vld [vmem:[#allocation14_spill] sm:$0xff] }
  0x7b   : > { %4017 = vmatprep.mubr.msk.f32.mxu0 %vm409_vm2, %v6157_v14  ;;  %4162 = vmatprep.subr.msk.mxu1 %vm474_vm0, %v5030_v57 }
  0x7c   : > { %4018 = vmatmul.mubr.msk.f32.gmra.mxu0 %vm409_vm2, %v6158_v17  ;;  %4212 = vmatprep.subr.msk.mxu0 %vm474_vm0, %v5039_v27 }
  0x7d   : > { %3968 = vmatmul.mubr.msk.f32.gmra.mxu1 %vm409_vm2, %v4449_v34  ;;  %4020 = vmatprep.mubr.msk.f32.mxu0 %vm409_vm2, %v6159_v23 }
  0x7e   : > { %3970 = vmatprep.mubr.msk.f32.mxu1 %vm409_vm2, %v4486_v47 }
  0x80   : > { %4021 = vmatmul.mubr.msk.f32.gmra.mxu0 %vm409_vm2, %v6160_v9 }
  0x81   : > { %3971 = vmatmul.mubr.msk.f32.gmra.mxu1 %vm409_vm2, %v4489_v48  ;;  %4023 = vmatprep.mubr.msk.f32.mxu0 %vm409_vm2, %v6161_v50  ;;  %v6165_v50 = vld [vmem:[#allocation26_spill] sm:$0xff] }
  0x82   : > { %3973 = vmatprep.mubr.msk.f32.mxu1 %vm409_vm2, %v4506_v55 }
  0x84   : > { %4024 = vmatmul.mubr.msk.f32.gmra.mxu0 %vm409_vm2, %v6162_v46 }
  0x85   : > { %3974 = vmatmul.mubr.msk.f32.gmra.mxu1 %vm409_vm2, %v4522_v61  ;;  %4026 = vmatprep.mubr.msk.f32.mxu0 %vm409_vm2, %v6163_v52  ;;  %v5156_v52 = vld [vmem:[%s4373_s26 + $0x190] sm:$0x3] }
  0x86   : > { %3976 = vmatprep.mubr.msk.f32.mxu1 %vm409_vm2, %v4566_v25 }
  0x88   : > { %4027 = vmatmul.mubr.msk.f32.gmra.mxu0 %vm409_vm2, %v6164_v41  ;;  %v5143_v41 = vld [vmem:[%s4373_s26 + $0x188] sm:$0xff] }
  0x89   : > { %3977 = vmatmul.mubr.msk.f32.gmra.mxu1 %vm409_vm2, %v4569_v30  ;;  %4029 = vmatprep.mubr.msk.f32.mxu0 %vm409_vm2, %v6165_v50  ;;  %v6166_v50 = vld [vmem:[#allocation2_spill] sm:$0xff] }
  0x8a   : > { %3979 = vmatprep.mubr.msk.f32.mxu1 %vm409_vm2, %v4610_v59 }
  0x8c   : > { %4030 = vmatmul.mubr.msk.f32.gmra.mxu0 %vm409_vm2, %v4704_v22  ;;  %v6167_v22 = vld [vmem:[#allocation3_spill] sm:$0xff] }
  0x8d   : > { %3980 = vmatmul.mubr.msk.f32.gmra.mxu1 %vm409_vm2, %v4613_v1  ;;  %4032 = vmatprep.mubr.msk.f32.mxu0 %vm409_vm2, %v4714_v7  ;;  %v6168_v7 = vld [vmem:[#allocation5_spill] sm:$0xff] }
  0x8e   : > { %3982 = vmatprep.mubr.msk.f32.mxu1 %vm409_vm2, %v4654_v24 }
  0x90   : > { %4033 = vmatmul.mubr.msk.f32.gmra.mxu0 %vm409_vm2, %v4729_v29  ;;  %v6169_v29 = vld [vmem:[#allocation7_spill] sm:$0xff] }
  0x91   : > { %3983 = vmatmul.mubr.msk.f32.gmra.mxu1 %vm409_vm2, %v4657_v40  ;;  %4035 = vmatprep.mubr.msk.f32.mxu0 %vm409_vm2, %v6166_v50  ;;  %v6170_v50 = vld [vmem:[#allocation9_spill] sm:$0xff] }
  0x92   : > { %3985 = vmatprep.mubr.msk.f32.mxu1 %vm409_vm2, %v4382_v5 }
  0x94   : > { %4036 = vmatmul.mubr.msk.f32.gmra.mxu0 %vm409_vm2, %v6167_v22  ;;  %v6171_v22 = vld [vmem:[#allocation11_spill] sm:$0xff] }
  0x95   : > { %3986 = vmatmul.mubr.msk.f32.gmra.mxu1 %vm409_vm2, %v4387_v8  ;;  %4038 = vmatprep.mubr.msk.f32.mxu0 %vm409_vm2, %v6168_v7  ;;  %v6172_v7 = vld [vmem:[#allocation13_spill] sm:$0xff] }
  0x96   : > { %3988 = vmatprep.mubr.msk.f32.mxu1 %vm409_vm2, %v4408_v19 }
  0x98   : > { %4039 = vmatmul.mubr.msk.f32.gmra.mxu0 %vm409_vm2, %v6169_v29  ;;  %v6173_v29 = vld [vmem:[#allocation15_spill] sm:$0xff] }
  0x99   : > { %3989 = vmatmul.mubr.msk.f32.gmra.mxu1 %vm409_vm2, %v4411_v20  ;;  %4041 = vmatprep.mubr.msk.f32.mxu0 %vm409_vm2, %v6170_v50  ;;  %v6174_v50 = vld [vmem:[#allocation17_spill] sm:$0xff] }
  0x9a   : > { %3991 = vmatprep.mubr.msk.f32.mxu1 %vm409_vm2, %v4452_v35 }
  0x9c   : > { %4042 = vmatmul.mubr.msk.f32.gmra.mxu0 %vm409_vm2, %v6171_v22  ;;  %v6175_v22 = vld [vmem:[#allocation20_spill] sm:$0xff] }
  0x9d   : > { %3992 = vmatmul.mubr.msk.f32.gmra.mxu1 %vm409_vm2, %v4463_v39  ;;  %4044 = vmatprep.mubr.msk.f32.mxu0 %vm409_vm2, %v6172_v7  ;;  %v6176_v7 = vld [vmem:[#allocation22_spill] sm:$0xff] }
  0x9e   : > { %3994 = vmatprep.mubr.msk.f32.mxu1 %vm409_vm2, %v4500_v53 }
  0xa0   : > { %4045 = vmatmul.mubr.msk.f32.gmra.mxu0 %vm409_vm2, %v6173_v29  ;;  %v5140_v29 = vld [vmem:[%s4373_s26 + $0x180] sm:$0xff] }
  0xa1   : > { %3995 = vmatmul.mubr.msk.f32.gmra.mxu1 %vm409_vm2, %v4503_v54  ;;  %4047 = vmatprep.mubr.msk.f32.mxu0 %vm409_vm2, %v6174_v50  ;;  %v6177_v50 = vld [vmem:[#allocation25_spill] sm:$0xff] }
  0xa2   : > { %3997 = vmatprep.mubr.msk.f32.mxu1 %vm409_vm2, %v4539_v2 }
  0xa4   : > { %4048 = vmatmul.mubr.msk.f32.gmra.mxu0 %vm409_vm2, %v6175_v22  ;;  %v1672_v22 = vrot.slane %v5143_v41, 1 }
  0xa5   : > { %3998 = vmatmul.mubr.msk.f32.gmra.mxu1 %vm409_vm2, %v4542_v6  ;;  %4050 = vmatprep.mubr.msk.f32.mxu0 %vm409_vm2, %v6176_v7  ;;  %v1671_v7 = vrot.slane %v5140_v29, 1 }
  0xa6   : > { %4000 = vmatprep.mubr.msk.f32.mxu1 %vm409_vm2, %v4574_v31 }
  0xa8   : > { %4051 = vmatmul.mubr.msk.f32.gmra.mxu0 %vm409_vm2, %v6177_v50  ;;  %v5168_v50 = vsel %vm326_vm1, %v1671_v7, %v1672_v22 }
  0xa9   : > { %4001 = vmatmul.mubr.msk.f32.gmra.mxu1 %vm409_vm2, %v4577_v32  ;;  %4053 = vmatprep.mubr.msk.f32.mxu0 %vm409_vm2, %v4690_v44  ;;  %v1674_v44 = vrot.slane %v5156_v52, 1  ;;  %6178 = vst [vmem:[#allocation23_spill] sm:$0xff] %v5168_v50 }
  0xaa   : > { %4003 = vmatprep.mubr.msk.f32.mxu1 %vm409_vm2, %v4618_v11 }
  0xac   : > { %4054 = vmatmul.mubr.msk.f32.gmra.mxu0 %vm409_vm2, %v4711_v62  ;;  %v5177_v62 = vsel %vm326_vm1, %v1672_v22, %v1674_v44  ;;  %v6190_v22 = vld [vmem:[#allocation44_spill] sm:$0xff] }
  0xad   : > { %4004 = vmatmul.mubr.msk.f32.gmra.mxu1 %vm409_vm2, %v6152_v0  ;;  %4056 = vmatprep.mubr.msk.f32.mxu0 %vm409_vm2, %v4719_v43  ;;  %6179 = vst [vmem:[#allocation4_spill] sm:$0xff] %v5177_v62 }
  0xae   : > { %4006 = vmatprep.mubr.msk.f32.mxu1 %vm409_vm2, %v4662_v51 }
  0xb0   : > { %4057 = vmatmul.mubr.msk.f32.gmra.mxu0 %vm409_vm2, %v4734_v36  ;;  %v5354_v36 = vld [vmem:[%s4373_s26 + $0x198] sm:$0xff] }
  0xb1   : > { %4007 = vmatmul.mubr.msk.f32.gmra.mxu1 %vm409_vm2, %v6153_v16  ;;  %4059 = vmatprep.mubr.msk.f32.mxu0 %vm409_vm2, %v5168_v50 }
  0xb2   : > { %4009 = vmatprep.mubr.msk.f32.mxu1 %vm409_vm2, %v5140_v29 }
  0xb4   : > { %4060 = vmatmul.mubr.msk.f32.gmra.mxu0 %vm409_vm2, %v5177_v62 }
  0xb5   : > { %4010 = vmatmul.mubr.msk.f32.gmra.mxu1 %vm409_vm2, %v5143_v41  ;;  %4114 = vmatprep.mubr.msk.f32.mxu0 %vm409_vm2, %v4446_v33  ;;  %v6180_v33 = vld [vmem:[#allocation34_spill] sm:$0xff] }
  0xb6   : > { %4064 = vmatprep.mubr.msk.f32.mxu1 %vm409_vm2, %v4752_v18 }
  0xb8   : > { %4115 = vmatmul.mubr.msk.f32.vlgmr.msra.gmra.mxu0 %vm409_vm2, %v4449_v34  ;;  %v6181_v34 = vld [vmem:[#allocation35_spill] sm:$0xff] }
  0xb9   : > { %4065 = vmatmul.mubr.msk.f32.vlgmr.msra.gmra.mxu1 %vm409_vm2, %v4764_v3  ;;  %4213 = vmatpush3.msk.msra.mxu0 %vm474_vm0, %v5039_v27 }
  0xba   : > { %4163 = vmatpush3.msk.msra.mxu1 %vm474_vm0, %v5030_v57  ;;  %4067 = vmatprep.mubr.msk.f32.mxu1 %vm409_vm2, %v4777_v4  ;;  %v1942_v57 = vrot.slane %v5140_v29, 2 }
  0xbb   : > { %4117 = vmatprep.mubr.msk.f32.mxu0 %vm409_vm2, %v4486_v47  ;;  %v6182_v47 = vld [vmem:[#allocation36_spill] sm:$0xff] }
  0xbc   : > { %4118 = vmatmul.mubr.msk.f32.gmra.mxu0 %vm409_vm2, %v4489_v48  ;;  %v6183_v48 = vld [vmem:[#allocation37_spill] sm:$0xff] }
  0xbd   : > { %4068 = vmatmul.mubr.msk.f32.gmra.mxu1 %vm409_vm2, %v4794_v21  ;;  %4120 = vmatprep.mubr.msk.f32.mxu0 %vm409_vm2, %v4506_v55  ;;  %v6184_v55 = vld [vmem:[#allocation38_spill] sm:$0xff] }
  0xbe   : > { %4070 = vmatprep.mubr.msk.f32.mxu1 %vm409_vm2, %v4800_v10 }
  0xc0   : > { %4121 = vmatmul.mubr.msk.f32.gmra.mxu0 %vm409_vm2, %v4522_v61 }
  0xc1   : > { %4071 = vmatmul.mubr.msk.f32.gmra.mxu1 %vm409_vm2, %v4811_v60  ;;  %4123 = vmatprep.mubr.msk.f32.mxu0 %vm409_vm2, %v4566_v25  ;;  %v6186_v25 = vld [vmem:[#allocation40_spill] sm:$0xff] }
  0xc2   : > { %4073 = vmatprep.mubr.msk.f32.mxu1 %vm409_vm2, %v4817_v49 }
  0xc4   : > { %4124 = vmatmul.mubr.msk.f32.gmra.mxu0 %vm409_vm2, %v4569_v30  ;;  %v6187_v30 = vld [vmem:[#allocation41_spill] sm:$0xff] }
  0xc5   : > { %4074 = vmatmul.mubr.msk.f32.gmra.mxu1 %vm409_vm2, %v6180_v33  ;;  %4126 = vmatprep.mubr.msk.f32.mxu0 %vm409_vm2, %v4610_v59 }
  0xc6   : > { %4076 = vmatprep.mubr.msk.f32.mxu1 %vm409_vm2, %v4834_v12 }
  0xc8   : > { %4127 = vmatmul.mubr.msk.f32.gmra.mxu0 %vm409_vm2, %v4613_v1 }
  0xc9   : > { %4077 = vmatmul.mubr.msk.f32.gmra.mxu1 %vm409_vm2, %v6181_v34  ;;  %4129 = vmatprep.mubr.msk.f32.mxu0 %vm409_vm2, %v4654_v24  ;;  %v6188_v24 = vld [vmem:[#allocation42_spill] sm:$0xff] }
  0xca   : > { %4079 = vmatprep.mubr.msk.f32.mxu1 %vm409_vm2, %v4851_v37 }
  0xcc   : > { %4130 = vmatmul.mubr.msk.f32.gmra.mxu0 %vm409_vm2, %v4657_v40  ;;  %v6189_v40 = vld [vmem:[#allocation43_spill] sm:$0xff] }
  0xcd   : > { %4080 = vmatmul.mubr.msk.f32.gmra.mxu1 %vm409_vm2, %v6182_v47  ;;  %4132 = vmatprep.mubr.msk.f32.mxu0 %vm409_vm2, %v4382_v5 }
  0xce   : > { %4082 = vmatprep.mubr.msk.f32.mxu1 %vm409_vm2, %v4868_v28 }
  0xd0   : > { %4133 = vmatmul.mubr.msk.f32.gmra.mxu0 %vm409_vm2, %v4387_v8 }
  0xd1   : > { %4083 = vmatmul.mubr.msk.f32.gmra.mxu1 %vm409_vm2, %v6183_v48  ;;  %4135 = vmatprep.mubr.msk.f32.mxu0 %vm409_vm2, %v4408_v19  ;;  %v6185_v19 = vld [vmem:[#allocation39_spill] sm:$0xff] }
  0xd2   : > { %4085 = vmatprep.mubr.msk.f32.mxu1 %vm409_vm2, %v4885_v45 }
  0xd4   : > { %4136 = vmatmul.mubr.msk.f32.gmra.mxu0 %vm409_vm2, %v4411_v20 }
  0xd5   : > { %4086 = vmatmul.mubr.msk.f32.gmra.mxu1 %vm409_vm2, %v6184_v55  ;;  %4138 = vmatprep.mubr.msk.f32.mxu0 %vm409_vm2, %v4452_v35 }
  0xd6   : > { %4088 = vmatprep.mubr.msk.f32.mxu1 %vm409_vm2, %v4902_v26 }
  0xd8   : > { %v5257_v5 = vpop.f32.mrf.mxu0  ;;  %4139 = vmatmul.mubr.msk.f32.gmra.mxu0 %vm409_vm2, %v4463_v39 }
  0xd9   : > { %v5261_v8 = vpop.f32.mrf.mxu1  ;;  %4089 = vmatmul.mubr.msk.f32.gmra.mxu1 %vm409_vm2, %v6185_v19  ;;  %4141 = vmatprep.mubr.msk.f32.mxu0 %vm409_vm2, %v4500_v53 }
  0xda   : > { %v5267_v20 = vpop.f32.mrf.mxu0  ;;  %4091 = vmatprep.mubr.msk.f32.mxu1 %vm409_vm2, %v4919_v42 }
  0xdb   : > { %v5271_v35 = vpop.f32.mrf.mxu1 }
  0xdc   : > { %v5273_v61 = vpop.f32.mrf.mxu0  ;;  %4142 = vmatmul.mubr.msk.f32.gmra.mxu0 %vm409_vm2, %v4503_v54 }
  0xdd   : > { %v5277_v39 = vpop.f32.mrf.mxu1  ;;  %4092 = vmatmul.mubr.msk.f32.gmra.mxu1 %vm409_vm2, %v6186_v25  ;;  %4144 = vmatprep.mubr.msk.f32.mxu0 %vm409_vm2, %v4539_v2 }
  0xde   : > { %v5283_v53 = vpop.f32.mrf.mxu0  ;;  %4094 = vmatprep.mubr.msk.f32.mxu1 %vm409_vm2, %v6187_v30 }
  0xdf   : > { %v5287_v59 = vpop.f32.mrf.mxu1 }
  0xe0   : > { %v5289_v1 = vpop.f32.mrf.mxu0  ;;  %4145 = vmatmul.mubr.msk.f32.gmra.mxu0 %vm409_vm2, %v4542_v6 }
  0xe1   : > { %v5293_v54 = vpop.f32.mrf.mxu1  ;;  %4095 = vmatmul.mubr.msk.f32.gmra.mxu1 %vm409_vm2, %v6188_v24  ;;  %4147 = vmatprep.mubr.msk.f32.mxu0 %vm409_vm2, %v4574_v31 }
  0xe2   : > { %v5299_v2 = vpop.f32.mrf.mxu0  ;;  %4097 = vmatprep.mubr.msk.f32.mxu1 %vm409_vm2, %v6189_v40 }
  0xe3   : > { %v5303_v7 = vpop.f32.mrf.mxu1 }
  0xe4   : > { %v5305_v44 = vpop.f32.mrf.mxu0  ;;  %4148 = vmatmul.mubr.msk.f32.gmra.mxu0 %vm409_vm2, %v4577_v32 }
  0xe5   : > { %v5309_v6 = vpop.f32.mrf.mxu1  ;;  %4098 = vmatmul.mubr.msk.f32.gmra.mxu1 %vm409_vm2, %v6190_v22  ;;  %4150 = vmatprep.mubr.msk.f32.mxu0 %vm409_vm2, %v4618_v11 }
  0xe6   : > { %v5315_v31 = vpop.f32.mrf.mxu0  ;;  %4100 = vmatprep.mubr.msk.f32.mxu1 %vm409_vm2, %v4970_v38 }
  0xe7   : > { %v5319_v18 = vpop.f32.mrf.mxu1 }
  0xe8   : > { %v5321_v3 = vpop.f32.mrf.mxu0  ;;  %4151 = vmatmul.mubr.msk.f32.gmra.mxu0 %vm409_vm2, %v6152_v0  ;;  %v1943_v0 = vrot.slane %v5143_v41, 2 }
  0xe9   : > { %v5325_v32 = vpop.f32.mrf.mxu1  ;;  %4101 = vmatmul.mubr.msk.f32.gmra.mxu1 %vm409_vm2, %v4981_v58  ;;  %4153 = vmatprep.mubr.msk.f32.mxu0 %vm409_vm2, %v4662_v51 }
  0xea   : > { %6191 = vst [vmem:[#allocation6_spill] sm:$0xff] %v5325_v32  ;;  %v5331_v11 = vpop.f32.mrf.mxu0  ;;  %4103 = vmatprep.mubr.msk.f32.mxu1 %vm409_vm2, %v4987_v56  ;;  %v5373_v32 = vld [vmem:[%s4373_s26 + $0x1a0] sm:$0xff] }
  0xeb   : > { %v5336_v27 = vpop.f32.mrf.mxu1 }
  0xec   : > { %6192 = vst [vmem:[#allocation8_spill] sm:$0xff] %v5336_v27  ;;  %v5339_v62 = vpop.f32.mrf.mxu0  ;;  %4154 = vmatmul.mubr.msk.f32.gmra.mxu0 %vm409_vm2, %v6153_v16  ;;  %v1945_v27 = vrot.slane %v5156_v52, 2  ;;  %v5360_v16 = vsel %vm995_vm3, %v1942_v57, %v1943_v0 }
  0xed   : > { %v5343_v50 = vpop.f32.mrf.mxu1  ;;  %4104 = vmatmul.mubr.msk.f32.gmra.mxu1 %vm409_vm2, %v4998_v63  ;;  %4156 = vmatprep.mubr.msk.f32.mxu0 %vm409_vm2, %v5140_v29  ;;  %6195 = vst [vmem:[#allocation14_spill] sm:$0xff] %v5360_v16 }
  0xee   : > { %6193 = vst [vmem:[#allocation10_spill] sm:$0xff] %v5343_v50  ;;  %v5349_v51 = vpop.f32.mrf.mxu0  ;;  %4106 = vmatprep.mubr.msk.f32.mxu1 %vm409_vm2, %v5004_v13  ;;  %v5380_v57 = vsel %vm995_vm3, %v1943_v0, %v1945_v27 }
  0xef   : > { %v5357_v43 = vpop.f32.mrf.mxu1  ;;  %6197 = vst [vmem:[#allocation34_spill] sm:$0xff] %v5380_v57 }
  0xf0   : > { %6194 = vst [vmem:[#allocation12_spill] sm:$0xff] %v5357_v43  ;;  %v5362_v50 = vpop.f32.mrf.mxu0  ;;  %4157 = vmatmul.mubr.msk.f32.gmra.mxu0 %vm409_vm2, %v5143_v41 }
  0xf1   : > { %v5366_v29 = vpop.f32.mrf.mxu1  ;;  %4107 = vmatmul.mubr.msk.f32.gmra.mxu1 %vm409_vm2, %v5013_v15  ;;  %4159 = vmatprep.mubr.msk.f32.mxu0 %vm409_vm2, %v5354_v36 }
  0xf2   : > { %6196 = vst [vmem:[#allocation19_spill] sm:$0xff] %v5366_v29  ;;  %v5375_v52 = vpop.f32.mrf.mxu0  ;;  %4109 = vmatprep.mubr.msk.f32.mxu1 %vm409_vm2, %v5360_v16 }
  0xf3   : > { %v5382_v43 = vpop.f32.mrf.mxu1 }
  0xf4   : > { %6198 = vst [vmem:[#allocation35_spill] sm:$0xff] %v5382_v43  ;;  %v5384_v41 = vpop.f32.mrf.mxu0  ;;  %4160 = vmatmul.mubr.msk.f32.gmra.mxu0 %vm409_vm2, %v5373_v32 }
  0xf5   : > { %v5388_v29 = vpop.f32.mrf.mxu1  ;;  %4110 = vmatmul.mubr.msk.f32.gmra.mxu1 %vm409_vm2, %v5380_v57  ;;  %4214 = vmatprep.mubr.msk.f32.mxu0 %vm409_vm2, %v4777_v4 }
  0xf6   : > { %6199 = vst [vmem:[#allocation36_spill] sm:$0xff] %v5388_v29  ;;  %v5394_v15 = vpop.f32.mrf.mxu0  ;;  %4164 = vmatprep.mubr.msk.f32.mxu1 %vm409_vm2, %v6157_v14 }
  0xf7   : > { %v5398_v27 = vpop.f32.mrf.mxu1 }
  0xf8   : > { %6200 = vst [vmem:[#allocation37_spill] sm:$0xff] %v5398_v27  ;;  %v3916_v0 = vpop.f32.mrf.mxu0  ;;  %4215 = vmatmul.mubr.msk.f32.vlgmr.msra.gmra.mxu0 %vm409_vm2, %v4794_v21 }
  0xf9   : > { %v3866_v43 = vpop.f32.mrf.mxu1  ;;  %4165 = vmatmul.mubr.msk.f32.vlgmr.msra.gmra.mxu1 %vm409_vm2, %v6158_v17  ;;  %4217 = vmatprep.mubr.msk.f32.mxu0 %vm409_vm2, %v4800_v10 }
  0xfa   : > { %v842_v4 = vadd.f32 %v3866_v43, %v5257_v5  ;;  %v1211_v29 = vpop.f32.mrf.mxu0  ;;  %4167 = vmatprep.mubr.msk.f32.mxu1 %vm409_vm2, %v6159_v23  ;;  %v6201_v23 = vld [vmem:[#allocation16_spill] sm:$0xff] }
  0xfb   : > { %v836_v14 = vpop.f32.mrf.mxu1 }
  0xfc   : > { %v5409_v57 = vadd.f32 %v3916_v0, %v842_v4  ;;  %v837_v27 = vadd.f32 %v836_v14, %v5267_v20  ;;  %v3919_v16 = vpop.f32.mrf.mxu0  ;;  %4218 = vmatmul.mubr.msk.f32.gmra.mxu0 %vm409_vm2, %v4811_v60  ;;  %v6203_v14 = vld [vmem:[#allocation24_spill] sm:$0xff] }
  0xfd   : > { %v3869_v21 = vpop.f32.mrf.mxu1  ;;  %4168 = vmatmul.mubr.msk.f32.gmra.mxu1 %vm409_vm2, %v6160_v9  ;;  %4220 = vmatprep.mubr.msk.f32.mxu0 %vm409_vm2, %v4817_v49 }
  0xfe   : > { %v5418_v43 = vadd.f32 %v1211_v29, %v837_v27  ;;  %v852_v10 = vadd.f32 %v3869_v21, %v5273_v61  ;;  %v1221_v17 = vpop.f32.mrf.mxu0  ;;  %4170 = vmatprep.mubr.msk.f32.mxu1 %vm409_vm2, %v6201_v23 }
  0xff   : > { %v846_v5 = vpop.f32.mrf.mxu1 }
 0x100   : > { %v5423_v20 = vadd.f32 %v3919_v16, %v852_v10  ;;  %v847_v60 = vadd.f32 %v846_v5, %v5283_v53  ;;  %v3922_v0 = vpop.f32.mrf.mxu0  ;;  %4221 = vmatmul.mubr.msk.f32.gmra.mxu0 %vm409_vm2, %v6180_v33  ;;  %v6202_v16 = vld [vmem:[#allocation21_spill] sm:$0xff]  ;;  %v6204_v10 = vld [vmem:[#allocation26_spill] sm:$0xff] }
 0x101   : > { %v3872_v9 = vpop.f32.mrf.mxu1  ;;  %4171 = vmatmul.mubr.msk.f32.gmra.mxu1 %vm409_vm2, %v6162_v46  ;;  %4223 = vmatprep.mubr.msk.f32.mxu0 %vm409_vm2, %v4834_v12 }
 0x102   : > { %v5432_v49 = vadd.f32 %v1221_v17, %v847_v60  ;;  %v862_v61 = vadd.f32 %v3872_v9, %v5289_v1  ;;  %v1231_v29 = vpop.f32.mrf.mxu0  ;;  %4173 = vmatprep.mubr.msk.f32.mxu1 %vm409_vm2, %v6202_v16  ;;  %v6205_v60 = vld [vmem:[#allocation28_spill] sm:$0xff]  ;;  %v6206_v9 = vld [vmem:[#allocation30_spill] sm:$0xff] }
 0x103   : > { %v856_v53 = vpop.f32.mrf.mxu1 }
 0x104   : > { %v5437_v27 = vadd.f32 %v3922_v0, %v862_v61  ;;  %v857_v33 = vadd.f32 %v856_v53, %v5299_v2  ;;  %v3925_v4 = vpop.f32.mrf.mxu0  ;;  %4224 = vmatmul.mubr.msk.f32.gmra.mxu0 %vm409_vm2, %v6181_v34  ;;  %v6207_v53 = vld [vmem:[#allocation32_spill] sm:$0xff] }
 0x105   : > { %v3875_v46 = vpop.f32.mrf.mxu1  ;;  %4174 = vmatmul.mubr.msk.f32.gmra.mxu1 %vm409_vm2, %v6203_v14  ;;  %4226 = vmatprep.mubr.msk.f32.mxu0 %vm409_vm2, %v4851_v37 }
 0x106   : > { %v5446_v12 = vadd.f32 %v1231_v29, %v857_v33  ;;  %v872_v1 = vadd.f32 %v3875_v46, %v5305_v44  ;;  %v1241_v21 = vpop.f32.mrf.mxu0  ;;  %4176 = vmatprep.mubr.msk.f32.mxu1 %vm409_vm2, %v6204_v10 }
 0x107   : > { %v866_v2 = vpop.f32.mrf.mxu1 }
 0x108   : > { %v5451_v17 = vadd.f32 %v3925_v4, %v872_v1  ;;  %v867_v34 = vadd.f32 %v866_v2, %v5315_v31  ;;  %v3928_v23 = vpop.f32.mrf.mxu0  ;;  %4227 = vmatmul.mubr.msk.f32.gmra.mxu0 %vm409_vm2, %v6182_v47  ;;  %v6208_v4 = vld [vmem:[#allocation2_spill] sm:$0xff]  ;;  %v6210_v2 = vld [vmem:[#allocation5_spill] sm:$0xff] }
 0x109   : > { %v3878_v5 = vpop.f32.mrf.mxu1  ;;  %4177 = vmatmul.mubr.msk.f32.gmra.mxu1 %vm409_vm2, %v6205_v60  ;;  %4229 = vmatprep.mubr.msk.f32.mxu0 %vm409_vm2, %v4868_v28  ;;  %v6211_v60 = vld [vmem:[#allocation7_spill] sm:$0xff] }
 0x10a   : > { %v5460_v37 = vadd.f32 %v1241_v21, %v867_v34  ;;  %v882_v44 = vadd.f32 %v3878_v5, %v5321_v3  ;;  %v1251_v0 = vpop.f32.mrf.mxu0  ;;  %4179 = vmatprep.mubr.msk.f32.mxu1 %vm409_vm2, %v6206_v9  ;;  %v6209_v21 = vld [vmem:[#allocation3_spill] sm:$0xff] }
 0x10b   : > { %v876_v31 = vpop.f32.mrf.mxu1 }
 0x10c   : > { %v5465_v61 = vadd.f32 %v3928_v23, %v882_v44  ;;  %v877_v47 = vadd.f32 %v876_v31, %v5331_v11  ;;  %v3931_v29 = vpop.f32.mrf.mxu0  ;;  %4230 = vmatmul.mubr.msk.f32.gmra.mxu0 %vm409_vm2, %v6183_v48 }
 0x10d   : > { %v3881_v16 = vpop.f32.mrf.mxu1  ;;  %4180 = vmatmul.mubr.msk.f32.gmra.mxu1 %vm409_vm2, %v6207_v53  ;;  %4232 = vmatprep.mubr.msk.f32.mxu0 %vm409_vm2, %v4885_v45  ;;  %v6214_v53 = vld [vmem:[#allocation13_spill] sm:$0xff] }
 0x10e   : > { %v5474_v28 = vadd.f32 %v1251_v0, %v877_v47  ;;  %v892_v3 = vadd.f32 %v3881_v16, %v5339_v62  ;;  %v1261_v33 = vpop.f32.mrf.mxu0  ;;  %4182 = vmatprep.mubr.msk.f32.mxu1 %vm409_vm2, %v6208_v4  ;;  %v6212_v0 = vld [vmem:[#allocation9_spill] sm:$0xff] }
 0x10f   : > { %v886_v11 = vpop.f32.mrf.mxu1 }
 0x110   : > { %v5479_v46 = vadd.f32 %v3931_v29, %v892_v3  ;;  %v887_v48 = vadd.f32 %v886_v11, %v5349_v51  ;;  %v3934_v14 = vpop.f32.mrf.mxu0  ;;  %4233 = vmatmul.mubr.msk.f32.gmra.mxu0 %vm409_vm2, %v6184_v55  ;;  %v6213_v29 = vld [vmem:[#allocation11_spill] sm:$0xff] }
 0x111   : > { %v3884_v1 = vpop.f32.mrf.mxu1  ;;  %4183 = vmatmul.mubr.msk.f32.gmra.mxu1 %vm409_vm2, %v6209_v21  ;;  %4235 = vmatprep.mubr.msk.f32.mxu0 %vm409_vm2, %v4902_v26  ;;  %v6215_v11 = vld [vmem:[#allocation15_spill] sm:$0xff] }
 0x112   : > { %v5488_v62 = vadd.f32 %v1261_v33, %v887_v48  ;;  %v902_v45 = vadd.f32 %v3884_v1, %v5362_v50  ;;  %v1271_v10 = vpop.f32.mrf.mxu0  ;;  %4185 = vmatprep.mubr.msk.f32.mxu1 %vm409_vm2, %v6210_v2 }
 0x113   : > { %v896_v51 = vpop.f32.mrf.mxu1 }
 0x114   : > { %v5493_v34 = vadd.f32 %v3934_v14, %v902_v45  ;;  %v897_v55 = vadd.f32 %v896_v51, %v5375_v52  ;;  %v3937_v23 = vpop.f32.mrf.mxu0  ;;  %4236 = vmatmul.mubr.msk.f32.gmra.mxu0 %vm409_vm2, %v6185_v19  ;;  %v6216_v14 = vld [vmem:[#allocation17_spill] sm:$0xff]  ;;  %v6218_v51 = vld [vmem:[#allocation22_spill] sm:$0xff] }
 0x115   : > { %v3887_v5 = vpop.f32.mrf.mxu1  ;;  %4186 = vmatmul.mubr.msk.f32.gmra.mxu1 %vm409_vm2, %v6211_v60  ;;  %4238 = vmatprep.mubr.msk.f32.mxu0 %vm409_vm2, %v4919_v42  ;;  %v6219_v60 = vld [vmem:[#allocation25_spill] sm:$0xff] }
 0x116   : > { %v5502_v26 = vadd.f32 %v1271_v10, %v897_v55  ;;  %v912_v50 = vadd.f32 %v3887_v5, %v5384_v41  ;;  %v1281_v44 = vpop.f32.mrf.mxu0  ;;  %4188 = vmatprep.mubr.msk.f32.mxu1 %vm409_vm2, %v6212_v0  ;;  %v6217_v10 = vld [vmem:[#allocation20_spill] sm:$0xff] }
 0x117   : > { %v906_v52 = vpop.f32.mrf.mxu1 }
 0x118   : > { %v5507_v9 = vadd.f32 %v3937_v23, %v912_v50  ;;  %v907_v19 = vadd.f32 %v906_v52, %v5394_v15  ;;  %v3940_v31 = vpop.f32.mrf.mxu0  ;;  %4239 = vmatmul.mubr.msk.f32.gmra.mxu0 %vm409_vm2, %v6186_v25 }
 0x119   : > { %v3890_v47 = vpop.f32.mrf.mxu1  ;;  %4189 = vmatmul.mubr.msk.f32.gmra.mxu1 %vm409_vm2, %v6213_v29  ;;  %4241 = vmatprep.mubr.msk.f32.mxu0 %vm409_vm2, %v6187_v30  ;;  %v6222_v29 = vld [vmem:[#allocation6_spill] sm:$0xff] }
 0x11a   : > { %v5516_v42 = vadd.f32 %v1281_v44, %v907_v19  ;;  %v922_v41 = vadd.f32 %v3890_v47, %v5261_v8  ;;  %v1291_v16 = vpop.f32.mrf.mxu0  ;;  %4191 = vmatprep.mubr.msk.f32.mxu1 %vm409_vm2, %v6214_v53  ;;  %v6220_v44 = vld [vmem:[#allocation27_spill] sm:$0xff]  ;;  %v2482_v53 = vrot.slane %v5354_v36, 1 }
 0x11b   : > { %v916_v15 = vpop.f32.mrf.mxu1 }
 0x11c   : > { %v5521_v3 = vadd.f32 %v3940_v31, %v922_v41  ;;  %v917_v25 = vadd.f32 %v916_v15, %v5271_v35  ;;  %v3943_v33 = vpop.f32.mrf.mxu0  ;;  %4242 = vmatmul.mubr.msk.f32.gmra.mxu0 %vm409_vm2, %v6188_v24  ;;  %v2754_v31 = vrot.slane %v5373_v32, 2  ;;  %v2483_v15 = vrot.slane %v5373_v32, 1  ;;  %v6228_v32 = vld [vmem:[#allocation10_spill] sm:$0xff] }
 0x11d   : > { %v3893_v4 = vpop.f32.mrf.mxu1  ;;  %4192 = vmatmul.mubr.msk.f32.gmra.mxu1 %vm409_vm2, %v6215_v11  ;;  %4244 = vmatprep.mubr.msk.f32.mxu0 %vm409_vm2, %v6189_v40 }
 0x11e   : > { %v5530_v8 = vadd.f32 %v1291_v16, %v917_v25  ;;  %v932_v30 = vadd.f32 %v3893_v4, %v5277_v39  ;;  %v1301_v48 = vpop.f32.mrf.mxu0  ;;  %4194 = vmatprep.mubr.msk.f32.mxu1 %vm409_vm2, %v6216_v14  ;;  %v6223_v16 = vld [vmem:[#allocation31_spill] sm:$0xff]  ;;  %v6226_v14 = vld [vmem:[#allocation33_spill] sm:$0xff] }
 0x11f   : > { %v926_v35 = vpop.f32.mrf.mxu1 }
 0x120   : > { %v5535_v1 = vadd.f32 %v3943_v33, %v932_v30  ;;  %v927_v24 = vadd.f32 %v926_v35, %v5287_v59  ;;  %v3946_v21 = vpop.f32.mrf.mxu0  ;;  %4245 = vmatmul.mubr.msk.f32.gmra.mxu0 %vm409_vm2, %v6190_v22  ;;  %v6225_v30 = vld [vmem:[#allocation18_spill] sm:$0xff] }
 0x121   : > { %v3896_v45 = vpop.f32.mrf.mxu1  ;;  %4195 = vmatmul.mubr.msk.f32.gmra.mxu1 %vm409_vm2, %v6217_v10  ;;  %4247 = vmatprep.mubr.msk.f32.mxu0 %vm409_vm2, %v4970_v38  ;;  %v6227_v35 = vld [vmem:[#allocation14_spill] sm:$0xff]  ;;  %v6229_v10 = vld [vmem:[#allocation23_spill] sm:$0xff] }
 0x122   : > { %v5544_v39 = vadd.f32 %v1301_v48, %v927_v24  ;;  %v942_v40 = vadd.f32 %v3896_v45, %v5293_v54  ;;  %v1311_v2 = vpop.f32.mrf.mxu0  ;;  %4197 = vmatprep.mubr.msk.f32.mxu1 %vm409_vm2, %v6218_v51 }
 0x123   : > { %v936_v59 = vpop.f32.mrf.mxu1 }
 0x124   : > { %v5549_v55 = vadd.f32 %v3946_v21, %v942_v40  ;;  %v937_v22 = vadd.f32 %v936_v59, %v5303_v7  ;;  %v3949_v23 = vpop.f32.mrf.mxu0  ;;  %4248 = vmatmul.mubr.msk.f32.gmra.mxu0 %vm409_vm2, %v4981_v58  ;;  %v2484_v59 = vsel %vm326_vm1, %v2482_v53, %v2483_v15 }
 0x125   : > { %v3899_v5 = vpop.f32.mrf.mxu1  ;;  %4198 = vmatmul.mubr.msk.f32.gmra.mxu1 %vm409_vm2, %v6219_v60  ;;  %4250 = vmatprep.mubr.msk.f32.mxu0 %vm409_vm2, %v4987_v56  ;;  %v6221_v56 = vld [vmem:[#allocation29_spill] sm:$0xff] }
 0x126   : > { %v5558_v38 = vadd.f32 %v1311_v2, %v937_v22  ;;  %v952_v54 = vadd.f32 %v3899_v5, %v5309_v6  ;;  %v1321_v50 = vpop.f32.mrf.mxu0  ;;  %4200 = vmatprep.mubr.msk.f32.mxu1 %vm409_vm2, %v6220_v44  ;;  %v2753_v6 = vrot.slane %v5354_v36, 2  ;;  %v6232_v44 = vld [vmem:[#allocation4_spill] sm:$0xff] }
 0x127   : > { %v946_v7 = vpop.f32.mrf.mxu1 }
 0x128   : > { %v5563_v0 = vadd.f32 %v3949_v23, %v952_v54  ;;  %v947_v58 = vadd.f32 %v946_v7, %v5319_v18  ;;  %v3952_v52 = vpop.f32.mrf.mxu0  ;;  %4251 = vmatmul.mubr.msk.f32.gmra.mxu0 %vm409_vm2, %v4998_v63  ;;  %v276_v63 = vld [vmem:[%s4373_s26 + $0x1a8] sm:$0x3]  ;;  %v2755_v40 = vsel %vm995_vm3, %v2753_v6, %v2754_v31  ;;  %v6230_v23 = vld [vmem:[#allocation12_spill] sm:$0xff]  ;;  %v6231_v54 = vld [vmem:[#allocation34_spill] sm:$0xff] }
 0x129   : > { %v3902_v19 = vpop.f32.mrf.mxu1  ;;  %4201 = vmatmul.mubr.msk.f32.gmra.mxu1 %vm409_vm2, %v6221_v56  ;;  %4253 = vmatprep.mubr.msk.f32.mxu0 %vm409_vm2, %v5004_v13  ;;  %v6224_v13 = vld [vmem:[#allocation8_spill] sm:$0xff]  ;;  %v2756_v24 = vrot.slane %v276_v63, 2  ;;  %v2485_v2 = vrot.slane %v276_v63, 1 }
 0x12a   : > { %v5574_v47 = vadd.f32 %v1321_v50, %v947_v58  ;;  %v962_v41 = vadd.f32 %v3902_v19, %v6222_v29  ;;  %v1331_v18 = vpop.f32.mrf.mxu0  ;;  %4203 = vmatprep.mubr.msk.f32.mxu1 %vm409_vm2, %v6223_v16 }
 0x12b   : > { %v956_v25 = vpop.f32.mrf.mxu1  ;;  %v2757_v7 = vsel %vm995_vm3, %v2754_v31, %v2756_v24  ;;  %v2486_v6 = vsel %vm326_vm1, %v2483_v15, %v2485_v2  ;;  %v6236_v15 = vld [vmem:[#allocation37_spill] sm:$0xff] }
 0x12c   : > { %v5582_v33 = vadd.f32 %v3952_v52, %v962_v41  ;;  %v957_v4 = vadd.f32 %v956_v25, %v6224_v13  ;;  %v3955_v11 = vpop.f32.mrf.mxu0  ;;  %4254 = vmatmul.mubr.msk.f32.gmra.mxu0 %vm409_vm2, %v6225_v30  ;;  %v6233_v52 = vld [vmem:[#allocation19_spill] sm:$0xff]  ;;  %v6235_v25 = vld [vmem:[#allocation36_spill] sm:$0xff] }
 0x12d   : > { %v3905_v48 = vpop.f32.mrf.mxu1  ;;  %4204 = vmatmul.mubr.msk.f32.gmra.mxu1 %vm409_vm2, %v6226_v14  ;;  %4256 = vmatprep.mubr.msk.f32.mxu0 %vm409_vm2, %v6227_v35 }
 0x12e   : > { %v5591_v36 = vadd.f32 %v1331_v18, %v957_v4  ;;  %v972_v21 = vadd.f32 %v3905_v48, %v6228_v32  ;;  %v1341_v45 = vpop.f32.mrf.mxu0  ;;  %4206 = vmatprep.mubr.msk.f32.mxu1 %vm409_vm2, %v6229_v10  ;;  %v6234_v18 = vld [vmem:[#allocation35_spill] sm:$0xff] }
 0x12f   : > { %v966_v51 = vpop.f32.mrf.mxu1 }
 0x130   : > { %v5598_v22 = vadd.f32 %v3955_v11, %v972_v21  ;;  %v967_v5 = vadd.f32 %v966_v51, %v6230_v23  ;;  %v3958_v60 = vpop.f32.mrf.mxu0  ;;  %4257 = vmatmul.mubr.msk.f32.gmra.mxu0 %vm409_vm2, %v6231_v54 }
 0x131   : > { %v3908_v50 = vpop.f32.mrf.mxu1  ;;  %4207 = vmatmul.mubr.msk.f32.gmra.mxu1 %vm409_vm2, %v6232_v44  ;;  %4259 = vmatprep.mubr.msk.f32.mxu0 %vm409_vm2, %v2755_v40 }
 0x132   : > { %v5607_v58 = vadd.f32 %v1341_v45, %v967_v5  ;;  %v982_v19 = vadd.f32 %v3908_v50, %v6233_v52  ;;  %v1351_v56 = vpop.f32.mrf.mxu0  ;;  %4209 = vmatprep.mubr.msk.f32.mxu1 %vm409_vm2, %v2484_v59 }
 0x133   : > { %v976_v29 = vpop.f32.mrf.mxu1 }
 0x134   : > { %v5612_v41 = vadd.f32 %v3958_v60, %v982_v19  ;;  %v977_v16 = vadd.f32 %v976_v29, %v6234_v18  ;;  %v3961_v63 = vpop.f32.mrf.mxu0  ;;  %4260 = vmatmul.mubr.msk.f32.gmra.mxu0 %vm409_vm2, %v2757_v7 }
 0x135   : > { %v3911_v53 = vpop.f32.mrf.mxu1  ;;  %4210 = vmatmul.mubr.msk.f32.gmra.mxu1 %vm409_vm2, %v2486_v6 }
 0x136   : > { %v5617_v31 = vadd.f32 %v1351_v56, %v977_v16  ;;  %v992_v13 = vadd.f32 %v3911_v53, %v6235_v25  ;;  %v1361_v4 = vpop.f32.mrf.mxu0 }
 0x137   : > { %v986_v11 = vpop.f32.mrf.mxu1 }
 0x138   : > { %v5620_v30 = vadd.f32 %v3961_v63, %v992_v13  ;;  %v987_v48 = vadd.f32 %v986_v11, %v6236_v15  ;;  %v4016_v14 = vpop.f32.mrf.mxu0 }
 0x139   : > { %v3966_v35 = vpop.f32.mrf.mxu1 }
 0x13a   : > { %v5623_v24 = vadd.f32 %v1361_v4, %v987_v48  ;;  %v1639_v32 = vadd.f32 %v3966_v35, %v5409_v57  ;;  %v1751_v21 = vpop.f32.mrf.mxu0 }
 0x13b   : > { %v1479_v45 = vpop.f32.mrf.mxu1 }
 0x13c   : > { %v5626_v10 = vadd.f32 %v4016_v14, %v1639_v32  ;;  %v1638_v40 = vadd.f32 %v1479_v45, %v5418_v43  ;;  %v4019_v2 = vpop.f32.mrf.mxu0 }
 0x13d   : > { %v3969_v51 = vpop.f32.mrf.mxu1 }
 0x13e   : > { %v5629_v59 = vadd.f32 %v1751_v21, %v1638_v40  ;;  %v1641_v23 = vadd.f32 %v3969_v51, %v5423_v20  ;;  %v1761_v5 = vpop.f32.mrf.mxu0 }
 0x13f   : > { %v1489_v60 = vpop.f32.mrf.mxu1 }
 0x140   : > { %v5632_v54 = vadd.f32 %v4019_v2, %v1641_v23  ;;  %v1640_v50 = vadd.f32 %v1489_v60, %v5432_v49  ;;  %v4022_v44 = vpop.f32.mrf.mxu0 }
 0x141   : > { %v3972_v57 = vpop.f32.mrf.mxu1 }
 0x142   : > { %v5635_v7 = vadd.f32 %v1761_v5, %v1640_v50  ;;  %v1643_v52 = vadd.f32 %v3972_v57, %v5437_v27  ;;  %v1771_v19 = vpop.f32.mrf.mxu0 }
 0x143   : > { %v1499_v43 = vpop.f32.mrf.mxu1 }
 0x144   : > { %v5638_v56 = vadd.f32 %v4022_v44, %v1643_v52  ;;  %v1642_v6 = vadd.f32 %v1499_v43, %v5446_v12  ;;  %v4025_v29 = vpop.f32.mrf.mxu0 }
 0x145   : > { %v3975_v20 = vpop.f32.mrf.mxu1 }
 0x146   : > { %v5641_v18 = vadd.f32 %v1771_v19, %v1642_v6  ;;  %v1645_v16 = vadd.f32 %v3975_v20, %v5451_v17  ;;  %v1781_v63 = vpop.f32.mrf.mxu0 }
 0x147   : > { %v1509_v49 = vpop.f32.mrf.mxu1 }
 0x148   : > { %v5644_v53 = vadd.f32 %v4025_v29, %v1645_v16  ;;  %v1644_v25 = vadd.f32 %v1509_v49, %v5460_v37  ;;  %v4028_v13 = vpop.f32.mrf.mxu0 }
 0x149   : > { %v3978_v27 = vpop.f32.mrf.mxu1 }
 0x14a   : > { %v5647_v4 = vadd.f32 %v1781_v63, %v1644_v25  ;;  %v1647_v11 = vadd.f32 %v3978_v27, %v5465_v61  ;;  %v1791_v15 = vpop.f32.mrf.mxu0 }
 0x14b   : > { %v1519_v12 = vpop.f32.mrf.mxu1 }
 0x14c   : > { %v5650_v48 = vadd.f32 %v4028_v13, %v1647_v11  ;;  %v1646_v14 = vadd.f32 %v1519_v12, %v5474_v28  ;;  %v4031_v35 = vpop.f32.mrf.mxu0 }
 0x14d   : > { %v3981_v17 = vpop.f32.mrf.mxu1 }
 0x14e   : > { %v5653_v32 = vadd.f32 %v1791_v15, %v1646_v14  ;;  %v1649_v21 = vadd.f32 %v3981_v17, %v5479_v46  ;;  %v1801_v45 = vpop.f32.mrf.mxu0 }
 0x14f   : > { %v1529_v37 = vpop.f32.mrf.mxu1 }
 0x150   : > { %v5656_v40 = vadd.f32 %v4031_v35, %v1649_v21  ;;  %v1648_v2 = vadd.f32 %v1529_v37, %v5488_v62  ;;  %v4034_v51 = vpop.f32.mrf.mxu0 }
 0x151   : > { %v3984_v61 = vpop.f32.mrf.mxu1 }
 0x152   : > { %v5659_v23 = vadd.f32 %v1801_v45, %v1648_v2  ;;  %v1651_v5 = vadd.f32 %v3984_v61, %v5493_v34  ;;  %v1811_v60 = vpop.f32.mrf.mxu0 }
 0x153   : > { %v1539_v28 = vpop.f32.mrf.mxu1 }
 0x154   : > { %v5662_v50 = vadd.f32 %v4034_v51, %v1651_v5  ;;  %v1650_v44 = vadd.f32 %v1539_v28, %v5502_v26  ;;  %v4037_v57 = vpop.f32.mrf.mxu0 }
 0x155   : > { %v3987_v46 = vpop.f32.mrf.mxu1 }
 0x156   : > { %v5665_v52 = vadd.f32 %v1811_v60, %v1650_v44  ;;  %v1653_v19 = vadd.f32 %v3987_v46, %v5507_v9  ;;  %v1821_v43 = vpop.f32.mrf.mxu0 }
 0x157   : > { %v1549_v62 = vpop.f32.mrf.mxu1 }
 0x158   : > { %v5668_v6 = vadd.f32 %v4037_v57, %v1653_v19  ;;  %v1652_v29 = vadd.f32 %v1549_v62, %v5516_v42  ;;  %v4040_v20 = vpop.f32.mrf.mxu0 }
 0x159   : > { %v3990_v34 = vpop.f32.mrf.mxu1 }
 0x15a   : > { %v5671_v16 = vadd.f32 %v1821_v43, %v1652_v29  ;;  %v1655_v63 = vadd.f32 %v3990_v34, %v5521_v3  ;;  %v1831_v49 = vpop.f32.mrf.mxu0 }
 0x15b   : > { %v1559_v26 = vpop.f32.mrf.mxu1 }
 0x15c   : > { %v5674_v25 = vadd.f32 %v4040_v20, %v1655_v63  ;;  %v1654_v13 = vadd.f32 %v1559_v26, %v5530_v8  ;;  %v4043_v27 = vpop.f32.mrf.mxu0 }
 0x15d   : > { %v3993_v9 = vpop.f32.mrf.mxu1 }
 0x15e   : > { %v5677_v11 = vadd.f32 %v1831_v49, %v1654_v13  ;;  %v1657_v15 = vadd.f32 %v3993_v9, %v5535_v1  ;;  %v1841_v12 = vpop.f32.mrf.mxu0 }
 0x15f   : > { %v1569_v42 = vpop.f32.mrf.mxu1 }
 0x160   : > { %v5680_v14 = vadd.f32 %v4043_v27, %v1657_v15  ;;  %v1656_v35 = vadd.f32 %v1569_v42, %v5544_v39  ;;  %v4046_v17 = vpop.f32.mrf.mxu0 }
 0x161   : > { %v3996_v3 = vpop.f32.mrf.mxu1 }
 0x162   : > { %6237 = vst [vmem:[#allocation38_spill] sm:$0xff] %v5680_v14  ;;  %v5683_v21 = vadd.f32 %v1841_v12, %v1656_v35  ;;  %v1659_v45 = vadd.f32 %v3996_v3, %v5549_v55  ;;  %v1851_v37 = vpop.f32.mrf.mxu0 }
 0x163   : > { %v1579_v8 = vpop.f32.mrf.mxu1 }
 0x164   : > { %6238 = vst [vmem:[#allocation39_spill] sm:$0xff] %v5683_v21  ;;  %v5686_v2 = vadd.f32 %v4046_v17, %v1659_v45  ;;  %v1658_v51 = vadd.f32 %v1579_v8, %v5558_v38  ;;  %v4049_v61 = vpop.f32.mrf.mxu0 }
 0x165   : > { %v3999_v1 = vpop.f32.mrf.mxu1 }
 0x166   : > { %6239 = vst [vmem:[#allocation40_spill] sm:$0xff] %v5686_v2  ;;  %v5689_v5 = vadd.f32 %v1851_v37, %v1658_v51  ;;  %v1661_v60 = vadd.f32 %v3999_v1, %v5563_v0  ;;  %v1861_v28 = vpop.f32.mrf.mxu0 }
 0x167   : > { %v1589_v39 = vpop.f32.mrf.mxu1 }
 0x168   : > { %6240 = vst [vmem:[#allocation41_spill] sm:$0xff] %v5689_v5  ;;  %v5692_v44 = vadd.f32 %v4049_v61, %v1661_v60  ;;  %v1660_v57 = vadd.f32 %v1589_v39, %v5574_v47  ;;  %v4052_v46 = vpop.f32.mrf.mxu0 }
 0x169   : > { %v4002_v55 = vpop.f32.mrf.mxu1 }
 0x16a   : > { %6241 = vst [vmem:[#allocation42_spill] sm:$0xff] %v5692_v44  ;;  %v5695_v19 = vadd.f32 %v1861_v28, %v1660_v57  ;;  %v1663_v43 = vadd.f32 %v4002_v55, %v5582_v33  ;;  %v1871_v62 = vpop.f32.mrf.mxu0 }
 0x16b   : > { %v1599_v38 = vpop.f32.mrf.mxu1 }
 0x16c   : > { %6242 = vst [vmem:[#allocation43_spill] sm:$0xff] %v5695_v19  ;;  %v5698_v29 = vadd.f32 %v4052_v46, %v1663_v43  ;;  %v1662_v20 = vadd.f32 %v1599_v38, %v5591_v36  ;;  %v4055_v34 = vpop.f32.mrf.mxu0 }
 0x16d   : > { %v4005_v0 = vpop.f32.mrf.mxu1 }
 0x16e   : > { %6243 = vst [vmem:[#allocation44_spill] sm:$0xff] %v5698_v29  ;;  %v5701_v63 = vadd.f32 %v1871_v62, %v1662_v20  ;;  %v1665_v49 = vadd.f32 %v4005_v0, %v5598_v22  ;;  %v1881_v26 = vpop.f32.mrf.mxu0 }
 0x16f   : > { %v1609_v47 = vpop.f32.mrf.mxu1 }
 0x170   : > { %6244 = vst [vmem:[#allocation16_spill] sm:$0xff] %v5701_v63  ;;  %v5704_v13 = vadd.f32 %v4055_v34, %v1665_v49  ;;  %v1664_v27 = vadd.f32 %v1609_v47, %v5607_v58  ;;  %v4058_v9 = vpop.f32.mrf.mxu0 }
 0x171   : > { %v4008_v33 = vpop.f32.mrf.mxu1 }
 0x172   : > { %6245 = vst [vmem:[#allocation21_spill] sm:$0xff] %v5704_v13  ;;  %v5707_v15 = vadd.f32 %v1881_v26, %v1664_v27  ;;  %v1667_v12 = vadd.f32 %v4008_v33, %v5612_v41  ;;  %v1891_v42 = vpop.f32.mrf.mxu0 }
 0x173   : > { %v1619_v36 = vpop.f32.mrf.mxu1 }
 0x174   : > { %6246 = vst [vmem:[#allocation24_spill] sm:$0xff] %v5707_v15  ;;  %v5710_v35 = vadd.f32 %v4058_v9, %v1667_v12  ;;  %v1666_v17 = vadd.f32 %v1619_v36, %v5617_v31  ;;  %v4061_v3 = vpop.f32.mrf.mxu0 }
 0x175   : > { %v4011_v22 = vpop.f32.mrf.mxu1 }
 0x176   : > { %6247 = vst [vmem:[#allocation26_spill] sm:$0xff] %v5710_v35  ;;  %v5713_v45 = vadd.f32 %v1891_v42, %v1666_v17  ;;  %v1669_v37 = vadd.f32 %v4011_v22, %v5620_v30  ;;  %v1901_v8 = vpop.f32.mrf.mxu0 }
 0x177   : > { %v1629_v58 = vpop.f32.mrf.mxu1 }
 0x178   : > { %6248 = vst [vmem:[#allocation28_spill] sm:$0xff] %v5713_v45  ;;  %v5716_v51 = vadd.f32 %v4061_v3, %v1669_v37  ;;  %v1668_v61 = vadd.f32 %v1629_v58, %v5623_v24  ;;  %v5719_v1 = vpop.f32.mrf.mxu0 }
 0x179   : > { %v4066_v41 = vpop.f32.mrf.mxu1 }
 0x17a   : > { %6249 = vst [vmem:[#allocation30_spill] sm:$0xff] %v5716_v51  ;;  %v5721_v60 = vadd.f32 %v1901_v8, %v1668_v61  ;;  %v5723_v28 = vpop.f32.mrf.mxu0 }
 0x17b   : > { %v2022_v31 = vpop.f32.mrf.mxu1 }
 0x17c   : > { %6250 = vst [vmem:[#allocation32_spill] sm:$0xff] %v5721_v60  ;;  %v5725_v39 = vpop.f32.mrf.mxu0 }
 0x17d   : > { %v5727_v57 = vpop.f32.mrf.mxu1 }
 0x17e   : > { %v5729_v46 = vpop.f32.mrf.mxu0 }
 0x17f   : > { %v5731_v30 = vpop.f32.mrf.mxu1 }
 0x180   : > { %v5733_v55 = vpop.f32.mrf.mxu0 }
 0x181   : > { %v5735_v43 = vpop.f32.mrf.mxu1 }
 0x182   : > { %v5737_v24 = vpop.f32.mrf.mxu0 }
 0x183   : > { %v5739_v62 = vpop.f32.mrf.mxu1 }
 0x184   : > { %v5741_v38 = vpop.f32.mrf.mxu0 }
 0x185   : > { %v5743_v20 = vpop.f32.mrf.mxu1 }
 0x186   : > { %v5745_v34 = vpop.f32.mrf.mxu0 }
 0x187   : > { %v5747_v0 = vpop.f32.mrf.mxu1 }
 0x188   : > { %v5749_v49 = vpop.f32.mrf.mxu0 }
 0x189   : > { %v5751_v26 = vpop.f32.mrf.mxu1 }
 0x18a   : > { %v5753_v47 = vpop.f32.mrf.mxu0 }
 0x18b   : > { %v5755_v27 = vpop.f32.mrf.mxu1 }
 0x18c   : > { %v5757_v9 = vpop.f32.mrf.mxu0 }
 0x18d   : > { %v5759_v33 = vpop.f32.mrf.mxu1 }
 0x18e   : > { %v5761_v12 = vpop.f32.mrf.mxu0 }
 0x18f   : > { %v5763_v42 = vpop.f32.mrf.mxu1 }
 0x190   : > { %v5765_v36 = vpop.f32.mrf.mxu0 }
 0x191   : > { %v5767_v17 = vpop.f32.mrf.mxu1 }
 0x192   : > { %v5769_v3 = vpop.f32.mrf.mxu0 }
 0x193   : > { %v5771_v22 = vpop.f32.mrf.mxu1 }
 0x194   : > { %v5773_v37 = vpop.f32.mrf.mxu0 }
 0x195   : > { %v5775_v8 = vpop.f32.mrf.mxu1 }
 0x196   : > { %v5777_v58 = vpop.f32.mrf.mxu0 }
 0x197   : > { %v5779_v61 = vpop.f32.mrf.mxu1 }
 0x198   : > { %v5781_v60 = vpop.f32.mrf.mxu0 }
 0x199   : > { %v5783_v51 = vpop.f32.mrf.mxu1 }
 0x19a   : > { %v5785_v45 = vpop.f32.mrf.mxu0 }
 0x19b   : > { %6251 = vst [vmem:[#allocation2_spill] sm:$0xff] %v5785_v45  ;;  %v5787_v35 = vpop.f32.mrf.mxu1 }
 0x19c   : > { %v5789_v15 = vpop.f32.mrf.mxu0 }
 0x19d   : > { %6252 = vst [vmem:[#allocation3_spill] sm:$0xff] %v5789_v15  ;;  %v5791_v13 = vpop.f32.mrf.mxu1 }
 0x19e   : > { %6253 = vst [vmem:[#allocation5_spill] sm:$0xff] %v5791_v13  ;;  %v5793_v63 = vpop.f32.mrf.mxu0 }
 0x19f   : > { %6254 = vst [vmem:[#allocation7_spill] sm:$0xff] %v5793_v63  ;;  %v5795_v29 = vpop.f32.mrf.mxu1 }
 0x1a0   : > { %6255 = vst [vmem:[#allocation9_spill] sm:$0xff] %v5795_v29  ;;  %v5797_v19 = vpop.f32.mrf.mxu0 }
 0x1a1   : > { %6256 = vst [vmem:[#allocation11_spill] sm:$0xff] %v5797_v19  ;;  %v5799_v44 = vpop.f32.mrf.mxu1 }
 0x1a2   : > { %6257 = vst [vmem:[#allocation13_spill] sm:$0xff] %v5799_v44  ;;  %v5801_v5 = vpop.f32.mrf.mxu0 }
 0x1a3   : > { %6258 = vst [vmem:[#allocation15_spill] sm:$0xff] %v5801_v5  ;;  %v5803_v2 = vpop.f32.mrf.mxu1 }
 0x1a4   : > { %6259 = vst [vmem:[#allocation17_spill] sm:$0xff] %v5803_v2  ;;  %v5805_v21 = vpop.f32.mrf.mxu0 }
 0x1a5   : > { %6260 = vst [vmem:[#allocation20_spill] sm:$0xff] %v5805_v21  ;;  %v5807_v45 = vpop.f32.mrf.mxu1 }
 0x1a6   : > { %v5809_v15 = vpop.f32.mrf.mxu0 }
 0x1a7   : > { %6261 = vst [vmem:[#allocation22_spill] sm:$0xff] %v5809_v15  ;;  %v5811_v13 = vpop.f32.mrf.mxu1 }
 0x1a8   : > { %6262 = vst [vmem:[#allocation25_spill] sm:$0xff] %v5811_v13  ;;  %v5813_v63 = vpop.f32.mrf.mxu0 }
 0x1a9   : > { %6263 = vst [vmem:[#allocation27_spill] sm:$0xff] %v5813_v63  ;;  %v5815_v29 = vpop.f32.mrf.mxu1 }
 0x1aa   : > { %6264 = vst [vmem:[#allocation29_spill] sm:$0xff] %v5815_v29  ;;  %v5817_v19 = vpop.f32.mrf.mxu0 }
 0x1ab   : > { %6265 = vst [vmem:[#allocation6_spill] sm:$0xff] %v5817_v19  ;;  %v5819_v14 = vpop.f32.mrf.mxu1  ;;  %v2182_v19 = vadd.f32 %v4066_v41, %v5626_v10  ;;  %v2183_v41 = vadd.f32 %v5731_v30, %v5635_v7  ;;  %v2185_v7 = vadd.f32 %v5739_v62, %v5641_v18  ;;  %v2188_v18 = vadd.f32 %v5743_v20, %v5644_v53 }
 0x1ac   : > { %6266 = vst [vmem:[#allocation31_spill] sm:$0xff] %v5819_v14  ;;  %v5821_v44 = vpop.f32.mrf.mxu0  ;;  %v2190_v20 = vadd.f32 %v5751_v26, %v5650_v48 }
 0x1ad   : > { %6267 = vst [vmem:[#allocation8_spill] sm:$0xff] %v5821_v44  ;;  %v5823_v5 = vpop.f32.mrf.mxu1 }
 0x1ae   : > { %6268 = vst [vmem:[#allocation18_spill] sm:$0xff] %v5823_v5  ;;  %v5825_v2 = vpop.f32.mrf.mxu0 }
 0x1af   : > { %6269 = vst [vmem:[#allocation33_spill] sm:$0xff] %v5825_v2  ;;  %v5827_v21 = vpop.f32.mrf.mxu1  ;;  %v2181_v2 = vadd.f32 %v2022_v31, %v5629_v59  ;;  %v2186_v31 = vadd.f32 %v5735_v43, %v5638_v56 }
 0x1b0   : > { %6270 = vst [vmem:[#allocation14_spill] sm:$0xff] %v5827_v21  ;;  %v5830_v15 = vpop.f32.mrf.mxu0 }
 0x1b1   : > { %6271 = vst [vmem:[#allocation10_spill] sm:$0xff] %v5830_v15  ;;  %v5832_v13 = vpop.f32.mrf.mxu1  ;;  %v2450_v15 = vadd.f32 %v5719_v1, %v2182_v19  ;;  %v2449_v10 = vadd.f32 %v5723_v28, %v2181_v2  ;;  %v5859_v19 = vld [vmem:[%s6025_s2] ss:$0 sm:$0xff] }
 0x1b2   : > { %6272 = vst [vmem:[#allocation23_spill] sm:$0xff] %v5832_v13  ;;  %v5834_v63 = vpop.f32.mrf.mxu0 }
 0x1b3   : > { %6273 = vst [vmem:[#allocation12_spill] sm:$0xff] %v5834_v63  ;;  %v5836_v29 = vpop.f32.mrf.mxu1  ;;  %v2184_v63 = vadd.f32 %v5727_v57, %v5632_v54 }
 0x1b4   : > { %6274 = vst [vmem:[#allocation34_spill] sm:$0xff] %v5836_v29  ;;  %v5839_v14 = vpop.f32.mrf.mxu0 }
 0x1b5   : > { %6275 = vst [vmem:[#allocation4_spill] sm:$0xff] %v5839_v14  ;;  %v5841_v44 = vpop.f32.mrf.mxu1  ;;  %v2452_v54 = vadd.f32 %v5725_v39, %v2184_v63 }
 0x1b6   : > { %v5844_v5 = vpop.f32.mrf.mxu0 }
 0x1b7   : > { %6276 = vst [vmem:[#allocation19_spill] sm:$0xff] %v5844_v5  ;;  %v5846_v21 = vpop.f32.mrf.mxu1 }
 0x1b8   : > { %v4216_v13 = vpop.f32.mrf.mxu0 }
 0x1b9   : > { %v4166_v29 = vpop.f32.mrf.mxu1 }
 0x1ba   : > { %v2722_v14 = vadd.f32 %v4166_v29, %v2450_v15  ;;  %v2833_v59 = vpop.f32.mrf.mxu0  ;;  %v2451_v29 = vadd.f32 %v5729_v46, %v2183_v41  ;;  %v2453_v46 = vadd.f32 %v5737_v24, %v2185_v7 }
 0x1bb   : > { %v2562_v1 = vpop.f32.mrf.mxu1 }
 0x1bc   : > { %v2993_v57 = vadd.f32 %v4216_v13, %v2722_v14  ;;  %v2721_v5 = vadd.f32 %v2562_v1, %v2449_v10  ;;  %v4219_v2 = vpop.f32.mrf.mxu0  ;;  %v2454_v13 = vadd.f32 %v5733_v55, %v2186_v31 }
 0x1bd   : > { %v4169_v56 = vpop.f32.mrf.mxu1 }
 0x1be   : > { %v3032_v15 = vadd.f32 %v5859_v19, %v2993_v57  ;;  %v2992_v28 = vadd.f32 %v2833_v59, %v2721_v5  ;;  %v2724_v63 = vadd.f32 %v4169_v56, %v2452_v54  ;;  %v2843_v14 = vpop.f32.mrf.mxu0  ;;  %v2187_v5 = vadd.f32 %v5747_v0, %v5647_v4 }
 0x1bf   : > { %v2572_v39 = vpop.f32.mrf.mxu1  ;;  %v2456_v54 = vadd.f32 %v5741_v38, %v2188_v18  ;;  %v2189_v0 = vadd.f32 %v5755_v27, %v5653_v32  ;;  %v2191_v18 = vadd.f32 %v5763_v42, %v5659_v23  ;;  %v2193_v42 = vadd.f32 %v5771_v22, %v5665_v52 }
 0x1c0   : > { %3064 = vst [vmem:[%s5867_s21 + $0x8] sm:$0xff] %v3032_v15  ;;  %v3031_v30 = vadd.f32 %v5859_v19, %v2992_v28  ;;  %v2995_v43 = vadd.f32 %v4219_v2, %v2724_v63  ;;  %v2723_v62 = vadd.f32 %v2572_v39, %v2451_v29  ;;  %v4222_v10 = vpop.f32.mrf.mxu0  ;;  %v2455_v56 = vadd.f32 %v5745_v34, %v2187_v5 }
 0x1c1   : > { %v4172_v41 = vpop.f32.mrf.mxu1  ;;  %v2458_v15 = vadd.f32 %v5749_v49, %v2190_v20  ;;  %v2192_v63 = vadd.f32 %v5759_v33, %v5656_v40  ;;  %v2194_v33 = vadd.f32 %v5767_v17, %v5662_v50  ;;  %v2196_v20 = vadd.f32 %v5775_v8, %v5668_v6 }
 0x1c2   : > { %3063 = vst [vmem:[%s5867_s21] sm:$0xff] %v3031_v30  ;;  %v3034_v55 = vadd.f32 %v5859_v19, %v2995_v43  ;;  %v2994_v59 = vadd.f32 %v2843_v14, %v2723_v62  ;;  %v2726_v31 = vadd.f32 %v4172_v41, %v2454_v13  ;;  %v2853_v53 = vpop.f32.mrf.mxu0  ;;  %v2457_v13 = vadd.f32 %v5753_v47, %v2189_v0 }
 0x1c3   : > { %v2582_v1 = vpop.f32.mrf.mxu1  ;;  %v2198_v8 = vadd.f32 %v5783_v51, %v5674_v25 }
 0x1c4   : > { %3066 = vst [vmem:[%s5867_s21 + $0x18] sm:$0xff] %v3034_v55  ;;  %v3033_v24 = vadd.f32 %v5859_v19, %v2994_v59  ;;  %v2997_v57 = vadd.f32 %v4222_v10, %v2726_v31  ;;  %v2725_v2 = vadd.f32 %v2582_v1, %v2453_v46  ;;  %v4225_v4 = vpop.f32.mrf.mxu0  ;;  %v2460_v10 = vadd.f32 %v5757_v9, %v2192_v63  ;;  %v6277_v63 = vld [vmem:[#allocation38_spill] sm:$0xff] }
 0x1c5   : > { %v4175_v7 = vpop.f32.mrf.mxu1  ;;  %v2459_v55 = vadd.f32 %v5761_v12, %v2191_v18  ;;  %v2462_v31 = vadd.f32 %v5765_v36, %v2194_v33  ;;  %v6280_v18 = vld [vmem:[#allocation39_spill] sm:$0xff] }
 0x1c6   : > { %3065 = vst [vmem:[%s5867_s21 + $0x10] sm:$0xff] %v3033_v24  ;;  %v3036_v48 = vadd.f32 %v5859_v19, %v2997_v57  ;;  %v2996_v26 = vadd.f32 %v2853_v53, %v2725_v2  ;;  %v2728_v29 = vadd.f32 %v4175_v7, %v2456_v54  ;;  %v2863_v38 = vpop.f32.mrf.mxu0  ;;  %v2461_v54 = vadd.f32 %v5769_v3, %v2193_v42 }
 0x1c7   : > { %v2592_v28 = vpop.f32.mrf.mxu1  ;;  %v2195_v57 = vadd.f32 %v5779_v61, %v5671_v16  ;;  %v2464_v7 = vadd.f32 %v5773_v37, %v2196_v20  ;;  %v2197_v61 = vadd.f32 %v5787_v35, %v5677_v11 }
 0x1c8   : > { %3068 = vst [vmem:[%s5867_s21 + $0x28] sm:$0xff] %v3036_v48  ;;  %v3035_v32 = vadd.f32 %v5859_v19, %v2996_v26  ;;  %v2999_v27 = vadd.f32 %v4225_v4, %v2728_v29  ;;  %v2727_v14 = vadd.f32 %v2592_v28, %v2455_v56  ;;  %v4228_v34 = vpop.f32.mrf.mxu0 }
 0x1c9   : > { %v4178_v39 = vpop.f32.mrf.mxu1  ;;  %v2463_v29 = vadd.f32 %v5777_v58, %v2195_v57 }
 0x1ca   : > { %3067 = vst [vmem:[%s5867_s21 + $0x20] sm:$0xff] %v3035_v32  ;;  %v3038_v49 = vadd.f32 %v5859_v19, %v2999_v27  ;;  %v2998_v30 = vadd.f32 %v2863_v38, %v2727_v14  ;;  %v2730_v43 = vadd.f32 %v4178_v39, %v2458_v15  ;;  %v2873_v40 = vpop.f32.mrf.mxu0  ;;  %v2466_v15 = vadd.f32 %v5781_v60, %v2198_v8  ;;  %v6278_v32 = vld [vmem:[#allocation5_spill] sm:$0xff] }
 0x1cb   : > { %v2602_v62 = vpop.f32.mrf.mxu1  ;;  %v2200_v27 = vadd.f32 %v6278_v32, %v6277_v63 }
 0x1cc   : > { %3070 = vst [vmem:[%s5867_s21 + $0x38] sm:$0xff] %v3038_v49  ;;  %v3037_v47 = vadd.f32 %v5859_v19, %v2998_v30  ;;  %v3001_v46 = vadd.f32 %v4228_v34, %v2730_v43  ;;  %v2729_v41 = vadd.f32 %v2602_v62, %v2457_v13  ;;  %v4231_v23 = vpop.f32.mrf.mxu0  ;;  %v6279_v34 = vld [vmem:[#allocation2_spill] sm:$0xff]  ;;  %v6281_v49 = vld [vmem:[#allocation9_spill] sm:$0xff]  ;;  %v6282_v62 = vld [vmem:[#allocation40_spill] sm:$0xff] }
 0x1cd   : > { %v4181_v5 = vpop.f32.mrf.mxu1  ;;  %v2465_v13 = vadd.f32 %v6279_v34, %v2197_v61  ;;  %v2199_v30 = vadd.f32 %v6281_v49, %v6280_v18 }
 0x1ce   : > { %3069 = vst [vmem:[%s5867_s21 + $0x30] sm:$0xff] %v3037_v47  ;;  %v3040_v50 = vadd.f32 %v5859_v19, %v3001_v46  ;;  %v3000_v17 = vadd.f32 %v2873_v40, %v2729_v41  ;;  %v2732_v59 = vadd.f32 %v4181_v5, %v2460_v10  ;;  %v2883_v9 = vpop.f32.mrf.mxu0  ;;  %v6283_v10 = vld [vmem:[#allocation13_spill] sm:$0xff]  ;;  %v6284_v41 = vld [vmem:[#allocation3_spill] sm:$0xff] }
 0x1cf   : > { %v2612_v53 = vpop.f32.mrf.mxu1  ;;  %v2202_v47 = vadd.f32 %v6283_v10, %v6282_v62  ;;  %v6300_v10 = vld [vmem:[#allocation21_spill] sm:$0xff] }
 0x1d0   : > { %3072 = vst [vmem:[%s5867_s21 + $0x48] sm:$0xff] %v3040_v50  ;;  %v3039_v52 = vadd.f32 %v5859_v19, %v3000_v17  ;;  %v3003_v22 = vadd.f32 %v4231_v23, %v2732_v59  ;;  %v2731_v1 = vadd.f32 %v2612_v53, %v2459_v55  ;;  %v4234_v12 = vpop.f32.mrf.mxu0  ;;  %v2468_v23 = vadd.f32 %v6284_v41, %v2200_v27  ;;  %v6285_v17 = vld [vmem:[#allocation41_spill] sm:$0xff]  ;;  %v6287_v53 = vld [vmem:[#allocation7_spill] sm:$0xff] }
 0x1d1   : > { %v4184_v24 = vpop.f32.mrf.mxu1  ;;  %v6286_v59 = vld [vmem:[#allocation17_spill] sm:$0xff]  ;;  %v2467_v20 = vadd.f32 %v6287_v53, %v2199_v30 }
 0x1d2   : > { %3071 = vst [vmem:[%s5867_s21 + $0x40] sm:$0xff] %v3039_v52  ;;  %v3042_v36 = vadd.f32 %v5859_v19, %v3003_v22  ;;  %v3002_v2 = vadd.f32 %v2883_v9, %v2731_v1  ;;  %v2734_v4 = vadd.f32 %v4184_v24, %v2462_v31  ;;  %v2893_v6 = vpop.f32.mrf.mxu0  ;;  %v2201_v9 = vadd.f32 %v6286_v59, %v6285_v17  ;;  %v6303_v59 = vld [vmem:[#allocation24_spill] sm:$0xff] }
 0x1d3   : > { %v2622_v0 = vpop.f32.mrf.mxu1 }
 0x1d4   : > { %3074 = vst [vmem:[%s5867_s21 + $0x58] sm:$0xff] %v3042_v36  ;;  %v3041_v3 = vadd.f32 %v5859_v19, %v3002_v2  ;;  %v3005_v56 = vadd.f32 %v4234_v12, %v2734_v4  ;;  %v2733_v48 = vadd.f32 %v2622_v0, %v2461_v54  ;;  %v4237_v16 = vpop.f32.mrf.mxu0  ;;  %v6288_v54 = vld [vmem:[#allocation11_spill] sm:$0xff]  ;;  %v6289_v36 = vld [vmem:[#allocation42_spill] sm:$0xff] }
 0x1d5   : > { %v4187_v26 = vpop.f32.mrf.mxu1  ;;  %v2470_v24 = vadd.f32 %v6288_v54, %v2202_v47  ;;  %v2204_v2 = vadd.f32 %v5807_v45, %v6289_v36  ;;  %v6301_v47 = vld [vmem:[#allocation18_spill] sm:$0xff] }
 0x1d6   : > { %3073 = vst [vmem:[%s5867_s21 + $0x50] sm:$0xff] %v3041_v3  ;;  %v3044_v25 = vadd.f32 %v5859_v19, %v3005_v56  ;;  %v3004_v51 = vadd.f32 %v2893_v6, %v2733_v48  ;;  %v2736_v38 = vadd.f32 %v4187_v26, %v2464_v7  ;;  %v2903_v37 = vpop.f32.mrf.mxu0  ;;  %v6290_v7 = vld [vmem:[#allocation15_spill] sm:$0xff] }
 0x1d7   : > { %v2632_v28 = vpop.f32.mrf.mxu1  ;;  %v2469_v3 = vadd.f32 %v6290_v7, %v2201_v9  ;;  %v6291_v48 = vld [vmem:[#allocation43_spill] sm:$0xff]  ;;  %v6304_v9 = vld [vmem:[#allocation14_spill] sm:$0xff] }
 0x1d8   : > { %3076 = vst [vmem:[%s5867_s21 + $0x68] sm:$0xff] %v3044_v25  ;;  %v3043_v11 = vadd.f32 %v5859_v19, %v3004_v51  ;;  %v3007_v35 = vadd.f32 %v4237_v16, %v2736_v38  ;;  %v2735_v14 = vadd.f32 %v2632_v28, %v2463_v29  ;;  %v4240_v58 = vpop.f32.mrf.mxu0  ;;  %v6292_v16 = vld [vmem:[#allocation25_spill] sm:$0xff]  ;;  %v6293_v51 = vld [vmem:[#allocation44_spill] sm:$0xff]  ;;  %v6309_v7 = vld [vmem:[#allocation34_spill] sm:$0xff] }
 0x1d9   : > { %v4190_v39 = vpop.f32.mrf.mxu1  ;;  %v2203_v61 = vadd.f32 %v6292_v16, %v6291_v48  ;;  %v6294_v38 = vld [vmem:[#allocation29_spill] sm:$0xff]  ;;  %v6295_v28 = vld [vmem:[#allocation20_spill] sm:$0xff] }
 0x1da   : > { %3075 = vst [vmem:[%s5867_s21 + $0x60] sm:$0xff] %v3043_v11  ;;  %v3046_v60 = vadd.f32 %v5859_v19, %v3007_v35  ;;  %v3006_v43 = vadd.f32 %v2903_v37, %v2735_v14  ;;  %v2738_v40 = vadd.f32 %v4190_v39, %v2466_v15  ;;  %v2913_v33 = vpop.f32.mrf.mxu0  ;;  %v2206_v37 = vadd.f32 %v6294_v38, %v6293_v51  ;;  %v6296_v14 = vld [vmem:[#allocation16_spill] sm:$0xff]  ;;  %v6298_v39 = vld [vmem:[#allocation22_spill] sm:$0xff]  ;;  %v6310_v48 = vld [vmem:[#allocation33_spill] sm:$0xff] }
 0x1db   : > { %v2642_v46 = vpop.f32.mrf.mxu1  ;;  %v2472_v63 = vadd.f32 %v6295_v28, %v2204_v2  ;;  %v2471_v18 = vadd.f32 %v6298_v39, %v2203_v61 }
 0x1dc   : > { %3078 = vst [vmem:[%s5867_s21 + $0x78] sm:$0xff] %v3046_v60  ;;  %v3045_v42 = vadd.f32 %v5859_v19, %v3006_v43  ;;  %v3009_v5 = vadd.f32 %v4240_v58, %v2738_v40  ;;  %v2737_v55 = vadd.f32 %v2642_v46, %v2465_v13  ;;  %v4243_v50 = vpop.f32.mrf.mxu0  ;;  %v6297_v58 = vld [vmem:[#allocation31_spill] sm:$0xff]  ;;  %v2208_v46 = vadd.f32 %v6301_v47, %v6300_v10 }
 0x1dd   : > { %v4193_v31 = vpop.f32.mrf.mxu1  ;;  %v2205_v34 = vadd.f32 %v6297_v58, %v6296_v14  ;;  %v6299_v40 = vld [vmem:[#allocation27_spill] sm:$0xff]  ;;  %v6314_v58 = vld [vmem:[#allocation32_spill] sm:$0xff] }
 0x1de   : > { %3077 = vst [vmem:[%s5867_s21 + $0x70] sm:$0xff] %v3045_v42  ;;  %v3048_v52 = vadd.f32 %v5859_v19, %v3009_v5  ;;  %v3008_v22 = vadd.f32 %v2913_v33, %v2737_v55  ;;  %v2740_v1 = vadd.f32 %v4193_v31, %v2468_v23  ;;  %v2923_v12 = vpop.f32.mrf.mxu0  ;;  %v2474_v33 = vadd.f32 %v6299_v40, %v2206_v37  ;;  %v6302_v55 = vld [vmem:[#allocation6_spill] sm:$0xff] }
 0x1df   : > { %v2652_v57 = vpop.f32.mrf.mxu1  ;;  %v2207_v31 = vadd.f32 %v6304_v9, %v6303_v59  ;;  %v6312_v37 = vld [vmem:[#allocation30_spill] sm:$0xff] }
 0x1e0   : > { %3080 = vst [vmem:[%s5867_s21 + $0x88] sm:$0xff] %v3048_v52  ;;  %v3047_v4 = vadd.f32 %v5859_v19, %v3008_v22  ;;  %v3011_v6 = vadd.f32 %v4243_v50, %v2740_v1  ;;  %v2739_v8 = vadd.f32 %v2652_v57, %v2467_v20  ;;  %v4246_v0 = vpop.f32.mrf.mxu0  ;;  %v2473_v50 = vadd.f32 %v6302_v55, %v2205_v34  ;;  %v6305_v1 = vld [vmem:[#allocation26_spill] sm:$0xff]  ;;  %v6307_v57 = vld [vmem:[#allocation8_spill] sm:$0xff] }
 0x1e1   : > { %v4196_v56 = vpop.f32.mrf.mxu1  ;;  %v2476_v36 = vadd.f32 %v6307_v57, %v2208_v46  ;;  %v2475_v16 = vadd.f32 %v6310_v48, %v2207_v31  ;;  %v2211_v34 = vadd.f32 %v5846_v21, %v6314_v58  ;;  %v6316_v21 = vld [vmem:[#allocation19_spill] sm:$0xff] }
 0x1e2   : > { %3079 = vst [vmem:[%s5867_s21 + $0x80] sm:$0xff] %v3047_v4  ;;  %v3050_v26 = vadd.f32 %v5859_v19, %v3011_v6  ;;  %v3010_v29 = vadd.f32 %v2923_v12, %v2739_v8  ;;  %v2742_v25 = vadd.f32 %v4196_v56, %v2470_v24  ;;  %v2933_v45 = vpop.f32.mrf.mxu0  ;;  %v6306_v12 = vld [vmem:[#allocation23_spill] sm:$0xff] }
 0x1e3   : > { %v2662_v15 = vpop.f32.mrf.mxu1  ;;  %v2210_v54 = vadd.f32 %v6306_v12, %v6305_v1  ;;  %v2479_v47 = vadd.f32 %v6316_v21, %v2211_v34 }
 0x1e4   : > { %3082 = vst [vmem:[%s5867_s21 + $0x98] sm:$0xff] %v3050_v26  ;;  %v3049_v32 = vadd.f32 %v5859_v19, %v3010_v29  ;;  %v3013_v27 = vadd.f32 %v4246_v0, %v2742_v25  ;;  %v2741_v11 = vadd.f32 %v2662_v15, %v2469_v3  ;;  %v4249_v35 = vpop.f32.mrf.mxu0  ;;  %v6308_v0 = vld [vmem:[#allocation28_spill] sm:$0xff]  ;;  %v2212_v15 = vadd.f32 %v5841_v44, %v6312_v37 }
 0x1e5   : > { %v4199_v13 = vpop.f32.mrf.mxu1  ;;  %v2209_v3 = vadd.f32 %v6309_v7, %v6308_v0 }
 0x1e6   : > { %3081 = vst [vmem:[%s5867_s21 + $0x90] sm:$0xff] %v3049_v32  ;;  %v3052_v49 = vadd.f32 %v5859_v19, %v3013_v27  ;;  %v3012_v30 = vadd.f32 %v2933_v45, %v2741_v11  ;;  %v2744_v60 = vadd.f32 %v4199_v13, %v2472_v63  ;;  %v2943_v43 = vpop.f32.mrf.mxu0  ;;  %v6311_v45 = vld [vmem:[#allocation10_spill] sm:$0xff]  ;;  %v6313_v11 = vld [vmem:[#allocation12_spill] sm:$0xff] }
 0x1e7   : > { %v2672_v62 = vpop.f32.mrf.mxu1  ;;  %v2478_v51 = vadd.f32 %v6311_v45, %v2210_v54 }
 0x1e8   : > { %3084 = vst [vmem:[%s5867_s21 + $0xa8] sm:$0xff] %v3052_v49  ;;  %v3051_v41 = vadd.f32 %v5859_v19, %v3012_v30  ;;  %v3015_v23 = vadd.f32 %v4249_v35, %v2744_v60  ;;  %v2743_v42 = vadd.f32 %v2672_v62, %v2471_v18  ;;  %v4252_v5 = vpop.f32.mrf.mxu0  ;;  %v2477_v35 = vadd.f32 %v6313_v11, %v2209_v3  ;;  %v6315_v30 = vld [vmem:[#allocation4_spill] sm:$0xff] }
 0x1e9   : > { %v4202_v17 = vpop.f32.mrf.mxu1  ;;  %v2480_v60 = vadd.f32 %v6315_v30, %v2212_v15 }
 0x1ea   : > { %3083 = vst [vmem:[%s5867_s21 + $0xa0] sm:$0xff] %v3051_v41  ;;  %v3054_v53 = vadd.f32 %v5859_v19, %v3015_v23  ;;  %v3014_v20 = vadd.f32 %v2943_v43, %v2743_v42  ;;  %v2746_v52 = vadd.f32 %v4202_v17, %v2474_v33  ;;  %v2953_v22 = vpop.f32.mrf.mxu0 }
 0x1eb   : > { %v2682_v24 = vpop.f32.mrf.mxu1 }
 0x1ec   : > { %3086 = vst [vmem:[%s5867_s21 + $0xb8] sm:$0xff] %v3054_v53  ;;  %v3053_v2 = vadd.f32 %v5859_v19, %v3014_v20  ;;  %v3017_v4 = vadd.f32 %v4252_v5, %v2746_v52  ;;  %v2745_v6 = vadd.f32 %v2682_v24, %v2473_v50  ;;  %v4255_v8 = vpop.f32.mrf.mxu0 }
 0x1ed   : > { %v4205_v56 = vpop.f32.mrf.mxu1 }
 0x1ee   : > { %3085 = vst [vmem:[%s5867_s21 + $0xb0] sm:$0xff] %v3053_v2  ;;  %v3056_v61 = vadd.f32 %v5859_v19, %v3017_v4  ;;  %v3016_v26 = vadd.f32 %v2953_v22, %v2745_v6  ;;  %v2748_v29 = vadd.f32 %v4205_v56, %v2476_v36  ;;  %v2963_v25 = vpop.f32.mrf.mxu0 }
 0x1ef   : > { %v2692_v38 = vpop.f32.mrf.mxu1 }
 0x1f0   : > { %3088 = vst [vmem:[%s5867_s21 + $0xc8] sm:$0xff] %v3056_v61  ;;  %v3055_v28 = vadd.f32 %v5859_v19, %v3016_v26  ;;  %v3019_v63 = vadd.f32 %v4255_v8, %v2748_v29  ;;  %v2747_v32 = vadd.f32 %v2692_v38, %v2475_v16  ;;  %v4258_v27 = vpop.f32.mrf.mxu0 }
 0x1f1   : > { %v4208_v14 = vpop.f32.mrf.mxu1 }
 0x1f2   : > { %3087 = vst [vmem:[%s5867_s21 + $0xc0] sm:$0xff] %v3055_v28  ;;  %v3058_v13 = vadd.f32 %v5859_v19, %v3019_v63  ;;  %v3018_v39 = vadd.f32 %v2963_v25, %v2747_v32  ;;  %v2750_v18 = vadd.f32 %v4208_v14, %v2478_v51  ;;  %v2973_v44 = vpop.f32.mrf.mxu0 }
 0x1f3   : > { %v2702_v49 = vpop.f32.mrf.mxu1 }
 0x1f4   : > { %3090 = vst [vmem:[%s5867_s21 + $0xd8] sm:$0xff] %v3058_v13  ;;  %v3057_v43 = vadd.f32 %v5859_v19, %v3018_v39  ;;  %v3021_v40 = vadd.f32 %v4258_v27, %v2750_v18  ;;  %v2749_v33 = vadd.f32 %v2702_v49, %v2477_v35  ;;  %v4261_v10 = vpop.f32.mrf.mxu0 }
 0x1f5   : > { %v4211_v62 = vpop.f32.mrf.mxu1 }
 0x1f6   : > { %3089 = vst [vmem:[%s5867_s21 + $0xd0] sm:$0xff] %v3057_v43  ;;  %v3060_v46 = vadd.f32 %v5859_v19, %v3021_v40  ;;  %v3020_v41 = vadd.f32 %v2973_v44, %v2749_v33  ;;  %v2752_v23 = vadd.f32 %v4211_v62, %v2480_v60  ;;  %v2983_v17 = vpop.f32.mrf.mxu0 }
 0x1f7   : > { %v2712_v42 = vpop.f32.mrf.mxu1 }
 0x1f8   : > { %3092 = vst [vmem:[%s5867_s21 + $0xe8] sm:$0xff] %v3060_v46  ;;  %v3059_v5 = vadd.f32 %v5859_v19, %v3020_v41  ;;  %v3023_v55 = vadd.f32 %v4261_v10, %v2752_v23  ;;  %v2751_v50 = vadd.f32 %v2712_v42, %v2479_v47 }
 0x1fa   : > { %3091 = vst [vmem:[%s5867_s21 + $0xe0] sm:$0xff] %v3059_v5  ;;  %v3062_v59 = vadd.f32 %v5859_v19, %v3023_v55  ;;  %v3022_v9 = vadd.f32 %v2983_v17, %v2751_v50 }
 0x1fc   : > { %3094 = vst [vmem:[%s5867_s21 + $0xf8] sm:$0xff] %v3062_v59  ;;  %v3061_v31 = vadd.f32 %v5859_v19, %v3022_v9 }
 0x1fe   : > { %3093 = vst [vmem:[%s5867_s21 + $0xf0] sm:$0xff] %v3061_v31 }
 0x1ff PF: > { %s13_s14 = sadd.s32 1, %s4311_s14   ;;  %s6317_s12 = smov %s4307_s13 }
 0x200   : > { %p10_p6 = scmp.ge.s32.totalorder %s13_s14, 4   ;;  %s6318_s13 = smov %s6320_s15 }
 0x202   :  { %12 = sbr.rel (!%p10_p6) target bundleno = 2 (0x2), region = 76 }

</bundles_post_ra>
